<compile_context>
chip_gen: v6e
topology: v6e:2x2x1
jax: 0.10.0
libtpu: 0.0.40
codegen_flags: <defaults>
</compile_context>

<pallas_src>
import functools
import math

import jax
import jax.numpy as jnp
import numpy as np
from jax.experimental import pallas as pl
from jax.experimental.pallas import tpu as pltpu


# ----------------------------------------------------------------------------
# Fused encoder-stack kernel: all layers in one pallas_call.
# ----------------------------------------------------------------------------
def _encoder_stack_kernel(
    x_ref, pos_ref,                      # [B, S, D] activations / pos embedding
    wqkv_ref, bqkv_ref,                  # [D, 3D], [1, 3D]   (wq|wk|wv fused)
    wo_ref, bo_ref,                      # [D, D],  [1, D]
    g1_ref, be1_ref,                     # LayerNorm 1 scale / shift  [1, D]
    w1_ref, b1_ref,                      # FFN in   [D, DFF], [1, DFF]
    w2_ref, b2_ref,                      # FFN out  [DFF, D], [1, D]
    g2_ref, be2_ref,                     # LayerNorm 2 scale / shift  [1, D]
    o_ref,                               # [B, S, D]
    *, num_layers, nhead, eps,
):
    B, S, D = x_ref.shape
    dh = D // nhead
    scale = 1.0 / math.sqrt(dh)

    x = x_ref[...].reshape(B * S, D)          # token-major [N, D]
    pos = pos_ref[...].reshape(B * S, D)

    wqkv, bqkv = wqkv_ref[...], bqkv_ref[...]
    wo, bo = wo_ref[...], bo_ref[...]
    g1, be1 = g1_ref[...], be1_ref[...]
    w1, b1 = w1_ref[...], b1_ref[...]
    w2, b2 = w2_ref[...], b2_ref[...]
    g2, be2 = g2_ref[...], be2_ref[...]

    # Loop-invariant: the fused QKV matmul feeds (x + pos) to all three
    # projections, but v must be x @ Wv -> subtract pos @ Wv (computed once).
    pos_v = jnp.dot(pos, wqkv[:, 2 * D:], preferred_element_type=jnp.float32)

    def layer_norm(y, g, b):
        m = jnp.mean(y, axis=-1, keepdims=True)
        yc = y - m
        var = jnp.mean(yc * yc, axis=-1, keepdims=True)
        return yc * jax.lax.rsqrt(var + eps) * g + b

    # `_get_clones` deep-copies -> every layer shares the same weights, so the
    # layer loop simply reuses the same VMEM-resident refs (unrolled).
    for _ in range(num_layers):
        qkv = jnp.dot(x + pos, wqkv, preferred_element_type=jnp.float32) + bqkv
        q = qkv[:, :D].reshape(B, S, D)
        k = qkv[:, D:2 * D].reshape(B, S, D)
        v = (qkv[:, 2 * D:] - pos_v).reshape(B, S, D)

        head_outs = []
        for h in range(nhead):               # unrolled; heads never leave VMEM
            sl = slice(h * dh, (h + 1) * dh)
            qh, kh, vh = q[:, :, sl], k[:, :, sl], v[:, :, sl]
            s = jnp.einsum("bqd,bkd->bqk", qh, kh,
                           preferred_element_type=jnp.float32) * scale
            s = s - jnp.max(s, axis=-1, keepdims=True)
            p = jnp.exp(s)
            p = p * pl.reciprocal(jnp.sum(p, axis=-1, keepdims=True), approx=True)
            head_outs.append(jnp.einsum("bqk,bkd->bqd", p, vh,
                                        preferred_element_type=jnp.float32))
        attn = jnp.concatenate(head_outs, axis=-1).reshape(B * S, D)
        attn = jnp.dot(attn, wo, preferred_element_type=jnp.float32) + bo

        x1 = layer_norm(x + attn, g1, be1)                       # post-norm 1
        hid = jnp.maximum(
            jnp.dot(x1, w1, preferred_element_type=jnp.float32) + b1, 0.0)
        ff = jnp.dot(hid, w2, preferred_element_type=jnp.float32) + b2
        x = layer_norm(x1 + ff, g2, be2)                         # post-norm 2

    o_ref[...] = x.reshape(B, S, D)


# ----------------------------------------------------------------------------
# Optional final LayerNorm (norm=None in this config; no zero-residual hack).
# ----------------------------------------------------------------------------
def _layernorm_kernel(x_ref, g_ref, b_ref, o_ref, *, eps):
    x = x_ref[...]
    m = jnp.mean(x, axis=-1, keepdims=True)
    xc = x - m
    var = jnp.mean(xc * xc, axis=-1, keepdims=True)
    o_ref[...] = xc * jax.lax.rsqrt(var + eps) * g_ref[...] + b_ref[...]


def _full_spec(shape):
    nd = len(shape)
    return pl.BlockSpec(shape, lambda i, _n=nd: (0,) * _n)


def pallas_layernorm(x2d, g, b, eps=1e-5):
    n, d = x2d.shape
    return pl.pallas_call(
        functools.partial(_layernorm_kernel, eps=eps),
        out_shape=jax.ShapeDtypeStruct((n, d), jnp.float32),
        grid=(1,),
        in_specs=[_full_spec((n, d)), _full_spec((1, d)), _full_spec((1, d))],
        out_specs=_full_spec((n, d)),
    )(x2d, g.reshape(1, d), b.reshape(1, d))


# ----------------------------------------------------------------------------
# Wrapper: one fused pallas_call for the whole encoder stack.
# ----------------------------------------------------------------------------
def transformer_encoder_forward(src, pos, params, num_layers, nhead,
                                final_norm=None, eps=1e-5):
    # src, pos: [S, B, D] (PyTorch seq-first convention)
    S, B, D = src.shape
    dff = params["w1"].shape[1]

    # Single host-side layout change to batch-major (and back at the end).
    x_bsd = jnp.transpose(src, (1, 0, 2))
    pos_bsd = jnp.transpose(pos, (1, 0, 2))

    wqkv = jnp.concatenate([params["wq"], params["wk"], params["wv"]], axis=1)
    bqkv = jnp.concatenate([params["bq"], params["bk"], params["bv"]]).reshape(1, 3 * D)

    args = (
        x_bsd, pos_bsd,
        wqkv, bqkv,
        params["wo"], params["bo"].reshape(1, D),
        params["g1"].reshape(1, D), params["be1"].reshape(1, D),
        params["w1"], params["b1"].reshape(1, dff),
        params["w2"], params["b2"].reshape(1, D),
        params["g2"].reshape(1, D), params["be2"].reshape(1, D),
    )

    out = pl.pallas_call(
        functools.partial(_encoder_stack_kernel,
                          num_layers=num_layers, nhead=nhead, eps=eps),
        out_shape=jax.ShapeDtypeStruct((B, S, D), jnp.float32),
        grid=(1,),
        in_specs=[_full_spec(a.shape) for a in args],
        out_specs=_full_spec((B, S, D)),
        compiler_params=pltpu.CompilerParams(
            dimension_semantics=("arbitrary",)),
    )(*args)

    out = jnp.transpose(out, (1, 0, 2))      # back to [S, B, D]
    if final_norm is not None:
        out = pallas_layernorm(out.reshape(S * B, D),
                               final_norm["g"], final_norm["b"], eps
                               ).reshape(S, B, D)
    return out


# ----------------------------------------------------------------------------
# Pure-JAX reference (for correctness check)
# ----------------------------------------------------------------------------
def ref_encoder(src, pos, p, num_layers, nhead, eps=1e-5):
    def ln(x, g, b):
        m = jnp.mean(x, -1, keepdims=True)
        v = jnp.mean((x - m) ** 2, -1, keepdims=True)
        return (x - m) / jnp.sqrt(v + eps) * g + b

    S, B, D = src.shape
    dh = D // nhead
    scale = 1.0 / math.sqrt(dh)
    x = src
    for _ in range(num_layers):
        qk = x + pos
        q = qk @ p["wq"] + p["bq"]
        k = qk @ p["wk"] + p["bk"]
        v = x @ p["wv"] + p["bv"]

        def heads(t):
            return t.reshape(S, B, nhead, dh).transpose(2, 1, 0, 3)

        qh, kh, vh = heads(q), heads(k), heads(v)
        s = jnp.einsum("hbqd,hbkd->hbqk", qh, kh) * scale
        a = jax.nn.softmax(s, axis=-1)
        oh = jnp.einsum("hbqk,hbkd->hbqd", a, vh)
        attn = oh.transpose(2, 1, 0, 3).reshape(S, B, D) @ p["wo"] + p["bo"]
        x = ln(x + attn, p["g1"], p["be1"])
        ff = jnp.maximum(x @ p["w1"] + p["b1"], 0.0) @ p["w2"] + p["b2"]
        x = ln(x + ff, p["g2"], p["be2"])
    return x


# ----------------------------------------------------------------------------
# Main
# ----------------------------------------------------------------------------
if __name__ == "__main__":
    S, B, D = 8, 2, 32          # seq, batch, d_model
    NHEAD, DFF, NLAYERS = 4, 64, 2

    key = jax.random.PRNGKey(0)
    keys = jax.random.split(key, 16)

    def w(k, shape, scale=0.05):
        return jax.random.normal(k, shape, jnp.float32) * scale

    # Single parameter set (deepcopy in _get_clones => identical across layers).
    params = {
        "wq": w(keys[0], (D, D)), "bq": w(keys[1], (D,)),
        "wk": w(keys[2], (D, D)), "bk": w(keys[3], (D,)),
        "wv": w(keys[4], (D, D)), "bv": w(keys[5], (D,)),
        "wo": w(keys[6], (D, D)), "bo": w(keys[7], (D,)),
        "g1": jnp.ones((D,), jnp.float32), "be1": jnp.zeros((D,), jnp.float32),
        "g2": jnp.ones((D,), jnp.float32), "be2": jnp.zeros((D,), jnp.float32),
        "w1": w(keys[8], (D, DFF)), "b1": w(keys[9], (DFF,)),
        "w2": w(keys[10], (DFF, D)), "b2": w(keys[11], (D,)),
    }

    src = jax.random.normal(keys[12], (S, B, D), jnp.float32)
    pos = jax.random.normal(keys[13], (S, B, D), jnp.float32)

    # TODO(synk): `mask` / `src_key_padding_mask` paths not exercised (None in this config).
    @jax.jit
    def fwd(src_, pos_, params_):
        return transformer_encoder_forward(src_, pos_, params_, NLAYERS, NHEAD,
                                           final_norm=None)

    out = jax.block_until_ready(fwd(src, pos, params))

    ref = ref_encoder(src, pos, params, NLAYERS, NHEAD)
    np.testing.assert_allclose(np.asarray(out), np.asarray(ref),
                               rtol=2e-3, atol=2e-3)

    print("KERNEL_OK")
</pallas_src>

<mosaic_0001>
module attributes {stable_mosaic.version = 11 : i64} {
  func.func @_encoder_stack_kernel(%arg0: i32, %arg1: memref<2x8x32xf32, #tpu.memory_space<vmem>>, %arg2: memref<2x8x32xf32, #tpu.memory_space<vmem>>, %arg3: memref<32x96xf32, #tpu.memory_space<vmem>>, %arg4: memref<1x96xf32, #tpu.memory_space<vmem>>, %arg5: memref<32x32xf32, #tpu.memory_space<vmem>>, %arg6: memref<1x32xf32, #tpu.memory_space<vmem>>, %arg7: memref<1x32xf32, #tpu.memory_space<vmem>>, %arg8: memref<1x32xf32, #tpu.memory_space<vmem>>, %arg9: memref<32x64xf32, #tpu.memory_space<vmem>>, %arg10: memref<1x64xf32, #tpu.memory_space<vmem>>, %arg11: memref<64x32xf32, #tpu.memory_space<vmem>>, %arg12: memref<1x32xf32, #tpu.memory_space<vmem>>, %arg13: memref<1x32xf32, #tpu.memory_space<vmem>>, %arg14: memref<1x32xf32, #tpu.memory_space<vmem>>, %arg15: memref<2x8x32xf32, #tpu.memory_space<vmem>>) attributes {dimension_semantics = [#tpu.dimension_semantics<arbitrary>], iteration_bounds = array<i64: 1>, scalar_prefetch = 0 : i64, scratch_operands = 0 : i64, tpu.core_type = #tpu.core_type<tc>, window_params = [{pipeline_mode = #tpu.pipeline_mode<synchronous>, transform_indices = @transform_0, window_bounds = array<i64: 2, 8, 32>}, {pipeline_mode = #tpu.pipeline_mode<synchronous>, transform_indices = @transform_1, window_bounds = array<i64: 2, 8, 32>}, {pipeline_mode = #tpu.pipeline_mode<synchronous>, transform_indices = @transform_2, window_bounds = array<i64: 32, 96>}, {pipeline_mode = #tpu.pipeline_mode<synchronous>, transform_indices = @transform_3, window_bounds = array<i64: 1, 96>}, {pipeline_mode = #tpu.pipeline_mode<synchronous>, transform_indices = @transform_4, window_bounds = array<i64: 32, 32>}, {pipeline_mode = #tpu.pipeline_mode<synchronous>, transform_indices = @transform_5, window_bounds = array<i64: 1, 32>}, {pipeline_mode = #tpu.pipeline_mode<synchronous>, transform_indices = @transform_6, window_bounds = array<i64: 1, 32>}, {pipeline_mode = #tpu.pipeline_mode<synchronous>, transform_indices = @transform_7, window_bounds = array<i64: 1, 32>}, {pipeline_mode = #tpu.pipeline_mode<synchronous>, transform_indices = @transform_8, window_bounds = array<i64: 32, 64>}, {pipeline_mode = #tpu.pipeline_mode<synchronous>, transform_indices = @transform_9, window_bounds = array<i64: 1, 64>}, {pipeline_mode = #tpu.pipeline_mode<synchronous>, transform_indices = @transform_10, window_bounds = array<i64: 64, 32>}, {pipeline_mode = #tpu.pipeline_mode<synchronous>, transform_indices = @transform_11, window_bounds = array<i64: 1, 32>}, {pipeline_mode = #tpu.pipeline_mode<synchronous>, transform_indices = @transform_12, window_bounds = array<i64: 1, 32>}, {pipeline_mode = #tpu.pipeline_mode<synchronous>, transform_indices = @transform_13, window_bounds = array<i64: 1, 32>}, {pipeline_mode = #tpu.pipeline_mode<synchronous>, transform_indices = @transform_14, window_bounds = array<i64: 2, 8, 32>}]} {
    %c0 = arith.constant 0 : index
    %c0_0 = arith.constant 0 : index
    %c0_1 = arith.constant 0 : index
    %0 = vector.load %arg1[%c0, %c0_0, %c0_1] : memref<2x8x32xf32, #tpu.memory_space<vmem>>, vector<2x8x32xf32>
    %1 = vector.shape_cast %0 : vector<2x8x32xf32> to vector<16x32xf32>
    %c0_2 = arith.constant 0 : index
    %c0_3 = arith.constant 0 : index
    %c0_4 = arith.constant 0 : index
    %2 = vector.load %arg2[%c0_2, %c0_3, %c0_4] : memref<2x8x32xf32, #tpu.memory_space<vmem>>, vector<2x8x32xf32>
    %3 = vector.shape_cast %2 : vector<2x8x32xf32> to vector<16x32xf32>
    %c0_5 = arith.constant 0 : index
    %c0_6 = arith.constant 0 : index
    %4 = vector.load %arg3[%c0_5, %c0_6] : memref<32x96xf32, #tpu.memory_space<vmem>>, vector<32x96xf32>
    %c0_7 = arith.constant 0 : index
    %c0_8 = arith.constant 0 : index
    %5 = vector.load %arg4[%c0_7, %c0_8] : memref<1x96xf32, #tpu.memory_space<vmem>>, vector<1x96xf32>
    %c0_9 = arith.constant 0 : index
    %c0_10 = arith.constant 0 : index
    %6 = vector.load %arg5[%c0_9, %c0_10] : memref<32x32xf32, #tpu.memory_space<vmem>>, vector<32x32xf32>
    %c0_11 = arith.constant 0 : index
    %c0_12 = arith.constant 0 : index
    %7 = vector.load %arg6[%c0_11, %c0_12] : memref<1x32xf32, #tpu.memory_space<vmem>>, vector<1x32xf32>
    %c0_13 = arith.constant 0 : index
    %c0_14 = arith.constant 0 : index
    %8 = vector.load %arg7[%c0_13, %c0_14] : memref<1x32xf32, #tpu.memory_space<vmem>>, vector<1x32xf32>
    %c0_15 = arith.constant 0 : index
    %c0_16 = arith.constant 0 : index
    %9 = vector.load %arg8[%c0_15, %c0_16] : memref<1x32xf32, #tpu.memory_space<vmem>>, vector<1x32xf32>
    %c0_17 = arith.constant 0 : index
    %c0_18 = arith.constant 0 : index
    %10 = vector.load %arg9[%c0_17, %c0_18] : memref<32x64xf32, #tpu.memory_space<vmem>>, vector<32x64xf32>
    %c0_19 = arith.constant 0 : index
    %c0_20 = arith.constant 0 : index
    %11 = vector.load %arg10[%c0_19, %c0_20] : memref<1x64xf32, #tpu.memory_space<vmem>>, vector<1x64xf32>
    %c0_21 = arith.constant 0 : index
    %c0_22 = arith.constant 0 : index
    %12 = vector.load %arg11[%c0_21, %c0_22] : memref<64x32xf32, #tpu.memory_space<vmem>>, vector<64x32xf32>
    %c0_23 = arith.constant 0 : index
    %c0_24 = arith.constant 0 : index
    %13 = vector.load %arg12[%c0_23, %c0_24] : memref<1x32xf32, #tpu.memory_space<vmem>>, vector<1x32xf32>
    %c0_25 = arith.constant 0 : index
    %c0_26 = arith.constant 0 : index
    %14 = vector.load %arg13[%c0_25, %c0_26] : memref<1x32xf32, #tpu.memory_space<vmem>>, vector<1x32xf32>
    %c0_27 = arith.constant 0 : index
    %c0_28 = arith.constant 0 : index
    %15 = vector.load %arg14[%c0_27, %c0_28] : memref<1x32xf32, #tpu.memory_space<vmem>>, vector<1x32xf32>
    %16 = vector.extract_strided_slice %4 {offsets = [0, 64], sizes = [32, 32], strides = [1, 1]} : vector<32x96xf32> to vector<32x32xf32>
    %cst = arith.constant dense<0.000000e+00> : vector<16x32xf32>
    %17 = tpu.matmul %3, %16, %cst {dimension_numbers = #tpu.dot_dimension_numbers<[1], [0], [0], [1], [0, 0, 1, 1], [], []>} : vector<16x32xf32>, vector<32x32xf32>, vector<16x32xf32> -> vector<16x32xf32>
    %18 = arith.addf %1, %3 : vector<16x32xf32>
    %cst_29 = arith.constant dense<0.000000e+00> : vector<16x96xf32>
    %19 = tpu.matmul %18, %4, %cst_29 {dimension_numbers = #tpu.dot_dimension_numbers<[1], [0], [0], [1], [0, 0, 1, 1], [], []>} : vector<16x32xf32>, vector<32x96xf32>, vector<16x96xf32> -> vector<16x96xf32>
    %20 = vector.broadcast %5 : vector<1x96xf32> to vector<16x96xf32>
    %21 = arith.addf %19, %20 : vector<16x96xf32>
    %22 = vector.extract_strided_slice %21 {offsets = [0, 0], sizes = [16, 32], strides = [1, 1]} : vector<16x96xf32> to vector<16x32xf32>
    %23 = vector.shape_cast %22 : vector<16x32xf32> to vector<2x8x32xf32>
    %24 = vector.extract_strided_slice %21 {offsets = [0, 32], sizes = [16, 32], strides = [1, 1]} : vector<16x96xf32> to vector<16x32xf32>
    %25 = vector.shape_cast %24 : vector<16x32xf32> to vector<2x8x32xf32>
    %26 = vector.extract_strided_slice %21 {offsets = [0, 64], sizes = [16, 32], strides = [1, 1]} : vector<16x96xf32> to vector<16x32xf32>
    %27 = arith.subf %26, %17 : vector<16x32xf32>
    %28 = vector.shape_cast %27 : vector<16x32xf32> to vector<2x8x32xf32>
    %29 = vector.extract_strided_slice %23 {offsets = [0, 0, 0], sizes = [2, 8, 8], strides = [1, 1, 1]} : vector<2x8x32xf32> to vector<2x8x8xf32>
    %30 = vector.extract_strided_slice %25 {offsets = [0, 0, 0], sizes = [2, 8, 8], strides = [1, 1, 1]} : vector<2x8x32xf32> to vector<2x8x8xf32>
    %31 = vector.extract_strided_slice %28 {offsets = [0, 0, 0], sizes = [2, 8, 8], strides = [1, 1, 1]} : vector<2x8x32xf32> to vector<2x8x8xf32>
    "tpu.trace_start"() <{level = 10 : i32, message = "bqd,bkd->bqk"}> : () -> ()
    %cst_30 = arith.constant dense<0.000000e+00> : vector<2x8x8xf32>
    %32 = tpu.matmul %29, %30, %cst_30 {dimension_numbers = #tpu.dot_dimension_numbers<[2], [2], [1], [1], [0, 0, 0, 1, 1, 1], [0], [0]>} : vector<2x8x8xf32>, vector<2x8x8xf32>, vector<2x8x8xf32> -> vector<2x8x8xf32>
    "tpu.trace_stop"() : () -> ()
    %cst_31 = arith.constant 0.353553385 : f32
    %33 = vector.broadcast %cst_31 : f32 to vector<2x8x8xf32>
    %34 = arith.mulf %32, %33 : vector<2x8x8xf32>
    %cst_32 = arith.constant dense<0xFF800000> : vector<2x8xf32>
    %35 = vector.multi_reduction <maximumf>, %34, %cst_32 [2] : vector<2x8x8xf32> to vector<2x8xf32>
    %36 = vector.shape_cast %35 : vector<2x8xf32> to vector<2x8x1xf32>
    %37 = vector.broadcast %36 : vector<2x8x1xf32> to vector<2x8x8xf32>
    %38 = arith.subf %34, %37 : vector<2x8x8xf32>
    %39 = math.exp %38 : vector<2x8x8xf32>
    %cst_33 = arith.constant dense<0.000000e+00> : vector<2x8xf32>
    %40 = vector.multi_reduction <add>, %39, %cst_33 [2] : vector<2x8x8xf32> to vector<2x8xf32>
    %41 = vector.shape_cast %40 : vector<2x8xf32> to vector<2x8x1xf32>
    %42 = tpu.reciprocal %41 {approx = true} : vector<2x8x1xf32> -> vector<2x8x1xf32>
    %43 = vector.broadcast %42 : vector<2x8x1xf32> to vector<2x8x8xf32>
    %44 = arith.mulf %39, %43 : vector<2x8x8xf32>
    "tpu.trace_start"() <{level = 10 : i32, message = "bqk,bkd->bqd"}> : () -> ()
    %cst_34 = arith.constant dense<0.000000e+00> : vector<2x8x8xf32>
    %45 = tpu.matmul %44, %31, %cst_34 {dimension_numbers = #tpu.dot_dimension_numbers<[2], [1], [1], [2], [0, 0, 0, 1, 1, 2], [0], [0]>} : vector<2x8x8xf32>, vector<2x8x8xf32>, vector<2x8x8xf32> -> vector<2x8x8xf32>
    "tpu.trace_stop"() : () -> ()
    %46 = vector.extract_strided_slice %23 {offsets = [0, 0, 8], sizes = [2, 8, 8], strides = [1, 1, 1]} : vector<2x8x32xf32> to vector<2x8x8xf32>
    %47 = vector.extract_strided_slice %25 {offsets = [0, 0, 8], sizes = [2, 8, 8], strides = [1, 1, 1]} : vector<2x8x32xf32> to vector<2x8x8xf32>
    %48 = vector.extract_strided_slice %28 {offsets = [0, 0, 8], sizes = [2, 8, 8], strides = [1, 1, 1]} : vector<2x8x32xf32> to vector<2x8x8xf32>
    "tpu.trace_start"() <{level = 10 : i32, message = "bqd,bkd->bqk"}> : () -> ()
    %cst_35 = arith.constant dense<0.000000e+00> : vector<2x8x8xf32>
    %49 = tpu.matmul %46, %47, %cst_35 {dimension_numbers = #tpu.dot_dimension_numbers<[2], [2], [1], [1], [0, 0, 0, 1, 1, 1], [0], [0]>} : vector<2x8x8xf32>, vector<2x8x8xf32>, vector<2x8x8xf32> -> vector<2x8x8xf32>
    "tpu.trace_stop"() : () -> ()
    %cst_36 = arith.constant 0.353553385 : f32
    %50 = vector.broadcast %cst_36 : f32 to vector<2x8x8xf32>
    %51 = arith.mulf %49, %50 : vector<2x8x8xf32>
    %cst_37 = arith.constant dense<0xFF800000> : vector<2x8xf32>
    %52 = vector.multi_reduction <maximumf>, %51, %cst_37 [2] : vector<2x8x8xf32> to vector<2x8xf32>
    %53 = vector.shape_cast %52 : vector<2x8xf32> to vector<2x8x1xf32>
    %54 = vector.broadcast %53 : vector<2x8x1xf32> to vector<2x8x8xf32>
    %55 = arith.subf %51, %54 : vector<2x8x8xf32>
    %56 = math.exp %55 : vector<2x8x8xf32>
    %cst_38 = arith.constant dense<0.000000e+00> : vector<2x8xf32>
    %57 = vector.multi_reduction <add>, %56, %cst_38 [2] : vector<2x8x8xf32> to vector<2x8xf32>
    %58 = vector.shape_cast %57 : vector<2x8xf32> to vector<2x8x1xf32>
    %59 = tpu.reciprocal %58 {approx = true} : vector<2x8x1xf32> -> vector<2x8x1xf32>
    %60 = vector.broadcast %59 : vector<2x8x1xf32> to vector<2x8x8xf32>
    %61 = arith.mulf %56, %60 : vector<2x8x8xf32>
    "tpu.trace_start"() <{level = 10 : i32, message = "bqk,bkd->bqd"}> : () -> ()
    %cst_39 = arith.constant dense<0.000000e+00> : vector<2x8x8xf32>
    %62 = tpu.matmul %61, %48, %cst_39 {dimension_numbers = #tpu.dot_dimension_numbers<[2], [1], [1], [2], [0, 0, 0, 1, 1, 2], [0], [0]>} : vector<2x8x8xf32>, vector<2x8x8xf32>, vector<2x8x8xf32> -> vector<2x8x8xf32>
    "tpu.trace_stop"() : () -> ()
    %63 = vector.extract_strided_slice %23 {offsets = [0, 0, 16], sizes = [2, 8, 8], strides = [1, 1, 1]} : vector<2x8x32xf32> to vector<2x8x8xf32>
    %64 = vector.extract_strided_slice %25 {offsets = [0, 0, 16], sizes = [2, 8, 8], strides = [1, 1, 1]} : vector<2x8x32xf32> to vector<2x8x8xf32>
    %65 = vector.extract_strided_slice %28 {offsets = [0, 0, 16], sizes = [2, 8, 8], strides = [1, 1, 1]} : vector<2x8x32xf32> to vector<2x8x8xf32>
    "tpu.trace_start"() <{level = 10 : i32, message = "bqd,bkd->bqk"}> : () -> ()
    %cst_40 = arith.constant dense<0.000000e+00> : vector<2x8x8xf32>
    %66 = tpu.matmul %63, %64, %cst_40 {dimension_numbers = #tpu.dot_dimension_numbers<[2], [2], [1], [1], [0, 0, 0, 1, 1, 1], [0], [0]>} : vector<2x8x8xf32>, vector<2x8x8xf32>, vector<2x8x8xf32> -> vector<2x8x8xf32>
    "tpu.trace_stop"() : () -> ()
    %cst_41 = arith.constant 0.353553385 : f32
    %67 = vector.broadcast %cst_41 : f32 to vector<2x8x8xf32>
    %68 = arith.mulf %66, %67 : vector<2x8x8xf32>
    %cst_42 = arith.constant dense<0xFF800000> : vector<2x8xf32>
    %69 = vector.multi_reduction <maximumf>, %68, %cst_42 [2] : vector<2x8x8xf32> to vector<2x8xf32>
    %70 = vector.shape_cast %69 : vector<2x8xf32> to vector<2x8x1xf32>
    %71 = vector.broadcast %70 : vector<2x8x1xf32> to vector<2x8x8xf32>
    %72 = arith.subf %68, %71 : vector<2x8x8xf32>
    %73 = math.exp %72 : vector<2x8x8xf32>
    %cst_43 = arith.constant dense<0.000000e+00> : vector<2x8xf32>
    %74 = vector.multi_reduction <add>, %73, %cst_43 [2] : vector<2x8x8xf32> to vector<2x8xf32>
    %75 = vector.shape_cast %74 : vector<2x8xf32> to vector<2x8x1xf32>
    %76 = tpu.reciprocal %75 {approx = true} : vector<2x8x1xf32> -> vector<2x8x1xf32>
    %77 = vector.broadcast %76 : vector<2x8x1xf32> to vector<2x8x8xf32>
    %78 = arith.mulf %73, %77 : vector<2x8x8xf32>
    "tpu.trace_start"() <{level = 10 : i32, message = "bqk,bkd->bqd"}> : () -> ()
    %cst_44 = arith.constant dense<0.000000e+00> : vector<2x8x8xf32>
    %79 = tpu.matmul %78, %65, %cst_44 {dimension_numbers = #tpu.dot_dimension_numbers<[2], [1], [1], [2], [0, 0, 0, 1, 1, 2], [0], [0]>} : vector<2x8x8xf32>, vector<2x8x8xf32>, vector<2x8x8xf32> -> vector<2x8x8xf32>
    "tpu.trace_stop"() : () -> ()
    %80 = vector.extract_strided_slice %23 {offsets = [0, 0, 24], sizes = [2, 8, 8], strides = [1, 1, 1]} : vector<2x8x32xf32> to vector<2x8x8xf32>
    %81 = vector.extract_strided_slice %25 {offsets = [0, 0, 24], sizes = [2, 8, 8], strides = [1, 1, 1]} : vector<2x8x32xf32> to vector<2x8x8xf32>
    %82 = vector.extract_strided_slice %28 {offsets = [0, 0, 24], sizes = [2, 8, 8], strides = [1, 1, 1]} : vector<2x8x32xf32> to vector<2x8x8xf32>
    "tpu.trace_start"() <{level = 10 : i32, message = "bqd,bkd->bqk"}> : () -> ()
    %cst_45 = arith.constant dense<0.000000e+00> : vector<2x8x8xf32>
    %83 = tpu.matmul %80, %81, %cst_45 {dimension_numbers = #tpu.dot_dimension_numbers<[2], [2], [1], [1], [0, 0, 0, 1, 1, 1], [0], [0]>} : vector<2x8x8xf32>, vector<2x8x8xf32>, vector<2x8x8xf32> -> vector<2x8x8xf32>
    "tpu.trace_stop"() : () -> ()
    %cst_46 = arith.constant 0.353553385 : f32
    %84 = vector.broadcast %cst_46 : f32 to vector<2x8x8xf32>
    %85 = arith.mulf %83, %84 : vector<2x8x8xf32>
    %cst_47 = arith.constant dense<0xFF800000> : vector<2x8xf32>
    %86 = vector.multi_reduction <maximumf>, %85, %cst_47 [2] : vector<2x8x8xf32> to vector<2x8xf32>
    %87 = vector.shape_cast %86 : vector<2x8xf32> to vector<2x8x1xf32>
    %88 = vector.broadcast %87 : vector<2x8x1xf32> to vector<2x8x8xf32>
    %89 = arith.subf %85, %88 : vector<2x8x8xf32>
    %90 = math.exp %89 : vector<2x8x8xf32>
    %cst_48 = arith.constant dense<0.000000e+00> : vector<2x8xf32>
    %91 = vector.multi_reduction <add>, %90, %cst_48 [2] : vector<2x8x8xf32> to vector<2x8xf32>
    %92 = vector.shape_cast %91 : vector<2x8xf32> to vector<2x8x1xf32>
    %93 = tpu.reciprocal %92 {approx = true} : vector<2x8x1xf32> -> vector<2x8x1xf32>
    %94 = vector.broadcast %93 : vector<2x8x1xf32> to vector<2x8x8xf32>
    %95 = arith.mulf %90, %94 : vector<2x8x8xf32>
    "tpu.trace_start"() <{level = 10 : i32, message = "bqk,bkd->bqd"}> : () -> ()
    %cst_49 = arith.constant dense<0.000000e+00> : vector<2x8x8xf32>
    %96 = tpu.matmul %95, %82, %cst_49 {dimension_numbers = #tpu.dot_dimension_numbers<[2], [1], [1], [2], [0, 0, 0, 1, 1, 2], [0], [0]>} : vector<2x8x8xf32>, vector<2x8x8xf32>, vector<2x8x8xf32> -> vector<2x8x8xf32>
    "tpu.trace_stop"() : () -> ()
    %97 = tpu.concatenate %45, %62, %79, %96 in 2 : vector<2x8x8xf32>, vector<2x8x8xf32>, vector<2x8x8xf32>, vector<2x8x8xf32> -> vector<2x8x32xf32>
    %98 = vector.shape_cast %97 : vector<2x8x32xf32> to vector<16x32xf32>
    %cst_50 = arith.constant dense<0.000000e+00> : vector<16x32xf32>
    %99 = tpu.matmul %98, %6, %cst_50 {dimension_numbers = #tpu.dot_dimension_numbers<[1], [0], [0], [1], [0, 0, 1, 1], [], []>} : vector<16x32xf32>, vector<32x32xf32>, vector<16x32xf32> -> vector<16x32xf32>
    %100 = vector.broadcast %7 : vector<1x32xf32> to vector<16x32xf32>
    %101 = arith.addf %99, %100 : vector<16x32xf32>
    %102 = arith.addf %1, %101 : vector<16x32xf32>
    %cst_51 = arith.constant dense<0.000000e+00> : vector<16xf32>
    %103 = vector.multi_reduction <add>, %102, %cst_51 [1] : vector<16x32xf32> to vector<16xf32>
    %104 = vector.shape_cast %103 : vector<16xf32> to vector<16x1xf32>
    %cst_52 = arith.constant 3.200000e+01 : f32
    %105 = vector.broadcast %cst_52 : f32 to vector<16x1xf32>
    %106 = arith.divf %104, %105 : vector<16x1xf32>
    %107 = vector.broadcast %106 : vector<16x1xf32> to vector<16x32xf32>
    %108 = arith.subf %102, %107 : vector<16x32xf32>
    %109 = arith.mulf %108, %108 : vector<16x32xf32>
    %cst_53 = arith.constant dense<0.000000e+00> : vector<16xf32>
    %110 = vector.multi_reduction <add>, %109, %cst_53 [1] : vector<16x32xf32> to vector<16xf32>
    %111 = vector.shape_cast %110 : vector<16xf32> to vector<16x1xf32>
    %cst_54 = arith.constant 3.200000e+01 : f32
    %112 = vector.broadcast %cst_54 : f32 to vector<16x1xf32>
    %113 = arith.divf %111, %112 : vector<16x1xf32>
    %cst_55 = arith.constant 9.99999974E-6 : f32
    %114 = vector.broadcast %cst_55 : f32 to vector<16x1xf32>
    %115 = arith.addf %113, %114 : vector<16x1xf32>
    %116 = math.rsqrt %115 : vector<16x1xf32>
    %117 = vector.broadcast %116 : vector<16x1xf32> to vector<16x32xf32>
    %118 = arith.mulf %108, %117 : vector<16x32xf32>
    %119 = vector.broadcast %8 : vector<1x32xf32> to vector<16x32xf32>
    %120 = arith.mulf %118, %119 : vector<16x32xf32>
    %121 = vector.broadcast %9 : vector<1x32xf32> to vector<16x32xf32>
    %122 = arith.addf %120, %121 : vector<16x32xf32>
    %cst_56 = arith.constant dense<0.000000e+00> : vector<16x64xf32>
    %123 = tpu.matmul %122, %10, %cst_56 {dimension_numbers = #tpu.dot_dimension_numbers<[1], [0], [0], [1], [0, 0, 1, 1], [], []>} : vector<16x32xf32>, vector<32x64xf32>, vector<16x64xf32> -> vector<16x64xf32>
    %124 = vector.broadcast %11 : vector<1x64xf32> to vector<16x64xf32>
    %125 = arith.addf %123, %124 : vector<16x64xf32>
    %cst_57 = arith.constant 0.000000e+00 : f32
    %126 = vector.broadcast %cst_57 : f32 to vector<16x64xf32>
    %127 = arith.maximumf %125, %126 : vector<16x64xf32>
    %cst_58 = arith.constant dense<0.000000e+00> : vector<16x32xf32>
    %128 = tpu.matmul %127, %12, %cst_58 {dimension_numbers = #tpu.dot_dimension_numbers<[1], [0], [0], [1], [0, 0, 1, 1], [], []>} : vector<16x64xf32>, vector<64x32xf32>, vector<16x32xf32> -> vector<16x32xf32>
    %129 = vector.broadcast %13 : vector<1x32xf32> to vector<16x32xf32>
    %130 = arith.addf %128, %129 : vector<16x32xf32>
    %131 = arith.addf %122, %130 : vector<16x32xf32>
    %cst_59 = arith.constant dense<0.000000e+00> : vector<16xf32>
    %132 = vector.multi_reduction <add>, %131, %cst_59 [1] : vector<16x32xf32> to vector<16xf32>
    %133 = vector.shape_cast %132 : vector<16xf32> to vector<16x1xf32>
    %cst_60 = arith.constant 3.200000e+01 : f32
    %134 = vector.broadcast %cst_60 : f32 to vector<16x1xf32>
    %135 = arith.divf %133, %134 : vector<16x1xf32>
    %136 = vector.broadcast %135 : vector<16x1xf32> to vector<16x32xf32>
    %137 = arith.subf %131, %136 : vector<16x32xf32>
    %138 = arith.mulf %137, %137 : vector<16x32xf32>
    %cst_61 = arith.constant dense<0.000000e+00> : vector<16xf32>
    %139 = vector.multi_reduction <add>, %138, %cst_61 [1] : vector<16x32xf32> to vector<16xf32>
    %140 = vector.shape_cast %139 : vector<16xf32> to vector<16x1xf32>
    %cst_62 = arith.constant 3.200000e+01 : f32
    %141 = vector.broadcast %cst_62 : f32 to vector<16x1xf32>
    %142 = arith.divf %140, %141 : vector<16x1xf32>
    %cst_63 = arith.constant 9.99999974E-6 : f32
    %143 = vector.broadcast %cst_63 : f32 to vector<16x1xf32>
    %144 = arith.addf %142, %143 : vector<16x1xf32>
    %145 = math.rsqrt %144 : vector<16x1xf32>
    %146 = vector.broadcast %145 : vector<16x1xf32> to vector<16x32xf32>
    %147 = arith.mulf %137, %146 : vector<16x32xf32>
    %148 = vector.broadcast %14 : vector<1x32xf32> to vector<16x32xf32>
    %149 = arith.mulf %147, %148 : vector<16x32xf32>
    %150 = vector.broadcast %15 : vector<1x32xf32> to vector<16x32xf32>
    %151 = arith.addf %149, %150 : vector<16x32xf32>
    %152 = arith.addf %151, %3 : vector<16x32xf32>
    %cst_64 = arith.constant dense<0.000000e+00> : vector<16x96xf32>
    %153 = tpu.matmul %152, %4, %cst_64 {dimension_numbers = #tpu.dot_dimension_numbers<[1], [0], [0], [1], [0, 0, 1, 1], [], []>} : vector<16x32xf32>, vector<32x96xf32>, vector<16x96xf32> -> vector<16x96xf32>
    %154 = vector.broadcast %5 : vector<1x96xf32> to vector<16x96xf32>
    %155 = arith.addf %153, %154 : vector<16x96xf32>
    %156 = vector.extract_strided_slice %155 {offsets = [0, 0], sizes = [16, 32], strides = [1, 1]} : vector<16x96xf32> to vector<16x32xf32>
    %157 = vector.shape_cast %156 : vector<16x32xf32> to vector<2x8x32xf32>
    %158 = vector.extract_strided_slice %155 {offsets = [0, 32], sizes = [16, 32], strides = [1, 1]} : vector<16x96xf32> to vector<16x32xf32>
    %159 = vector.shape_cast %158 : vector<16x32xf32> to vector<2x8x32xf32>
    %160 = vector.extract_strided_slice %155 {offsets = [0, 64], sizes = [16, 32], strides = [1, 1]} : vector<16x96xf32> to vector<16x32xf32>
    %161 = arith.subf %160, %17 : vector<16x32xf32>
    %162 = vector.shape_cast %161 : vector<16x32xf32> to vector<2x8x32xf32>
    %163 = vector.extract_strided_slice %157 {offsets = [0, 0, 0], sizes = [2, 8, 8], strides = [1, 1, 1]} : vector<2x8x32xf32> to vector<2x8x8xf32>
    %164 = vector.extract_strided_slice %159 {offsets = [0, 0, 0], sizes = [2, 8, 8], strides = [1, 1, 1]} : vector<2x8x32xf32> to vector<2x8x8xf32>
    %165 = vector.extract_strided_slice %162 {offsets = [0, 0, 0], sizes = [2, 8, 8], strides = [1, 1, 1]} : vector<2x8x32xf32> to vector<2x8x8xf32>
    "tpu.trace_start"() <{level = 10 : i32, message = "bqd,bkd->bqk"}> : () -> ()
    %cst_65 = arith.constant dense<0.000000e+00> : vector<2x8x8xf32>
    %166 = tpu.matmul %163, %164, %cst_65 {dimension_numbers = #tpu.dot_dimension_numbers<[2], [2], [1], [1], [0, 0, 0, 1, 1, 1], [0], [0]>} : vector<2x8x8xf32>, vector<2x8x8xf32>, vector<2x8x8xf32> -> vector<2x8x8xf32>
    "tpu.trace_stop"() : () -> ()
    %cst_66 = arith.constant 0.353553385 : f32
    %167 = vector.broadcast %cst_66 : f32 to vector<2x8x8xf32>
    %168 = arith.mulf %166, %167 : vector<2x8x8xf32>
    %cst_67 = arith.constant dense<0xFF800000> : vector<2x8xf32>
    %169 = vector.multi_reduction <maximumf>, %168, %cst_67 [2] : vector<2x8x8xf32> to vector<2x8xf32>
    %170 = vector.shape_cast %169 : vector<2x8xf32> to vector<2x8x1xf32>
    %171 = vector.broadcast %170 : vector<2x8x1xf32> to vector<2x8x8xf32>
    %172 = arith.subf %168, %171 : vector<2x8x8xf32>
    %173 = math.exp %172 : vector<2x8x8xf32>
    %cst_68 = arith.constant dense<0.000000e+00> : vector<2x8xf32>
    %174 = vector.multi_reduction <add>, %173, %cst_68 [2] : vector<2x8x8xf32> to vector<2x8xf32>
    %175 = vector.shape_cast %174 : vector<2x8xf32> to vector<2x8x1xf32>
    %176 = tpu.reciprocal %175 {approx = true} : vector<2x8x1xf32> -> vector<2x8x1xf32>
    %177 = vector.broadcast %176 : vector<2x8x1xf32> to vector<2x8x8xf32>
    %178 = arith.mulf %173, %177 : vector<2x8x8xf32>
    "tpu.trace_start"() <{level = 10 : i32, message = "bqk,bkd->bqd"}> : () -> ()
    %cst_69 = arith.constant dense<0.000000e+00> : vector<2x8x8xf32>
    %179 = tpu.matmul %178, %165, %cst_69 {dimension_numbers = #tpu.dot_dimension_numbers<[2], [1], [1], [2], [0, 0, 0, 1, 1, 2], [0], [0]>} : vector<2x8x8xf32>, vector<2x8x8xf32>, vector<2x8x8xf32> -> vector<2x8x8xf32>
    "tpu.trace_stop"() : () -> ()
    %180 = vector.extract_strided_slice %157 {offsets = [0, 0, 8], sizes = [2, 8, 8], strides = [1, 1, 1]} : vector<2x8x32xf32> to vector<2x8x8xf32>
    %181 = vector.extract_strided_slice %159 {offsets = [0, 0, 8], sizes = [2, 8, 8], strides = [1, 1, 1]} : vector<2x8x32xf32> to vector<2x8x8xf32>
    %182 = vector.extract_strided_slice %162 {offsets = [0, 0, 8], sizes = [2, 8, 8], strides = [1, 1, 1]} : vector<2x8x32xf32> to vector<2x8x8xf32>
    "tpu.trace_start"() <{level = 10 : i32, message = "bqd,bkd->bqk"}> : () -> ()
    %cst_70 = arith.constant dense<0.000000e+00> : vector<2x8x8xf32>
    %183 = tpu.matmul %180, %181, %cst_70 {dimension_numbers = #tpu.dot_dimension_numbers<[2], [2], [1], [1], [0, 0, 0, 1, 1, 1], [0], [0]>} : vector<2x8x8xf32>, vector<2x8x8xf32>, vector<2x8x8xf32> -> vector<2x8x8xf32>
    "tpu.trace_stop"() : () -> ()
    %cst_71 = arith.constant 0.353553385 : f32
    %184 = vector.broadcast %cst_71 : f32 to vector<2x8x8xf32>
    %185 = arith.mulf %183, %184 : vector<2x8x8xf32>
    %cst_72 = arith.constant dense<0xFF800000> : vector<2x8xf32>
    %186 = vector.multi_reduction <maximumf>, %185, %cst_72 [2] : vector<2x8x8xf32> to vector<2x8xf32>
    %187 = vector.shape_cast %186 : vector<2x8xf32> to vector<2x8x1xf32>
    %188 = vector.broadcast %187 : vector<2x8x1xf32> to vector<2x8x8xf32>
    %189 = arith.subf %185, %188 : vector<2x8x8xf32>
    %190 = math.exp %189 : vector<2x8x8xf32>
    %cst_73 = arith.constant dense<0.000000e+00> : vector<2x8xf32>
    %191 = vector.multi_reduction <add>, %190, %cst_73 [2] : vector<2x8x8xf32> to vector<2x8xf32>
    %192 = vector.shape_cast %191 : vector<2x8xf32> to vector<2x8x1xf32>
    %193 = tpu.reciprocal %192 {approx = true} : vector<2x8x1xf32> -> vector<2x8x1xf32>
    %194 = vector.broadcast %193 : vector<2x8x1xf32> to vector<2x8x8xf32>
    %195 = arith.mulf %190, %194 : vector<2x8x8xf32>
    "tpu.trace_start"() <{level = 10 : i32, message = "bqk,bkd->bqd"}> : () -> ()
    %cst_74 = arith.constant dense<0.000000e+00> : vector<2x8x8xf32>
    %196 = tpu.matmul %195, %182, %cst_74 {dimension_numbers = #tpu.dot_dimension_numbers<[2], [1], [1], [2], [0, 0, 0, 1, 1, 2], [0], [0]>} : vector<2x8x8xf32>, vector<2x8x8xf32>, vector<2x8x8xf32> -> vector<2x8x8xf32>
    "tpu.trace_stop"() : () -> ()
    %197 = vector.extract_strided_slice %157 {offsets = [0, 0, 16], sizes = [2, 8, 8], strides = [1, 1, 1]} : vector<2x8x32xf32> to vector<2x8x8xf32>
    %198 = vector.extract_strided_slice %159 {offsets = [0, 0, 16], sizes = [2, 8, 8], strides = [1, 1, 1]} : vector<2x8x32xf32> to vector<2x8x8xf32>
    %199 = vector.extract_strided_slice %162 {offsets = [0, 0, 16], sizes = [2, 8, 8], strides = [1, 1, 1]} : vector<2x8x32xf32> to vector<2x8x8xf32>
    "tpu.trace_start"() <{level = 10 : i32, message = "bqd,bkd->bqk"}> : () -> ()
    %cst_75 = arith.constant dense<0.000000e+00> : vector<2x8x8xf32>
    %200 = tpu.matmul %197, %198, %cst_75 {dimension_numbers = #tpu.dot_dimension_numbers<[2], [2], [1], [1], [0, 0, 0, 1, 1, 1], [0], [0]>} : vector<2x8x8xf32>, vector<2x8x8xf32>, vector<2x8x8xf32> -> vector<2x8x8xf32>
    "tpu.trace_stop"() : () -> ()
    %cst_76 = arith.constant 0.353553385 : f32
    %201 = vector.broadcast %cst_76 : f32 to vector<2x8x8xf32>
    %202 = arith.mulf %200, %201 : vector<2x8x8xf32>
    %cst_77 = arith.constant dense<0xFF800000> : vector<2x8xf32>
    %203 = vector.multi_reduction <maximumf>, %202, %cst_77 [2] : vector<2x8x8xf32> to vector<2x8xf32>
    %204 = vector.shape_cast %203 : vector<2x8xf32> to vector<2x8x1xf32>
    %205 = vector.broadcast %204 : vector<2x8x1xf32> to vector<2x8x8xf32>
    %206 = arith.subf %202, %205 : vector<2x8x8xf32>
    %207 = math.exp %206 : vector<2x8x8xf32>
    %cst_78 = arith.constant dense<0.000000e+00> : vector<2x8xf32>
    %208 = vector.multi_reduction <add>, %207, %cst_78 [2] : vector<2x8x8xf32> to vector<2x8xf32>
    %209 = vector.shape_cast %208 : vector<2x8xf32> to vector<2x8x1xf32>
    %210 = tpu.reciprocal %209 {approx = true} : vector<2x8x1xf32> -> vector<2x8x1xf32>
    %211 = vector.broadcast %210 : vector<2x8x1xf32> to vector<2x8x8xf32>
    %212 = arith.mulf %207, %211 : vector<2x8x8xf32>
    "tpu.trace_start"() <{level = 10 : i32, message = "bqk,bkd->bqd"}> : () -> ()
    %cst_79 = arith.constant dense<0.000000e+00> : vector<2x8x8xf32>
    %213 = tpu.matmul %212, %199, %cst_79 {dimension_numbers = #tpu.dot_dimension_numbers<[2], [1], [1], [2], [0, 0, 0, 1, 1, 2], [0], [0]>} : vector<2x8x8xf32>, vector<2x8x8xf32>, vector<2x8x8xf32> -> vector<2x8x8xf32>
    "tpu.trace_stop"() : () -> ()
    %214 = vector.extract_strided_slice %157 {offsets = [0, 0, 24], sizes = [2, 8, 8], strides = [1, 1, 1]} : vector<2x8x32xf32> to vector<2x8x8xf32>
    %215 = vector.extract_strided_slice %159 {offsets = [0, 0, 24], sizes = [2, 8, 8], strides = [1, 1, 1]} : vector<2x8x32xf32> to vector<2x8x8xf32>
    %216 = vector.extract_strided_slice %162 {offsets = [0, 0, 24], sizes = [2, 8, 8], strides = [1, 1, 1]} : vector<2x8x32xf32> to vector<2x8x8xf32>
    "tpu.trace_start"() <{level = 10 : i32, message = "bqd,bkd->bqk"}> : () -> ()
    %cst_80 = arith.constant dense<0.000000e+00> : vector<2x8x8xf32>
    %217 = tpu.matmul %214, %215, %cst_80 {dimension_numbers = #tpu.dot_dimension_numbers<[2], [2], [1], [1], [0, 0, 0, 1, 1, 1], [0], [0]>} : vector<2x8x8xf32>, vector<2x8x8xf32>, vector<2x8x8xf32> -> vector<2x8x8xf32>
    "tpu.trace_stop"() : () -> ()
    %cst_81 = arith.constant 0.353553385 : f32
    %218 = vector.broadcast %cst_81 : f32 to vector<2x8x8xf32>
    %219 = arith.mulf %217, %218 : vector<2x8x8xf32>
    %cst_82 = arith.constant dense<0xFF800000> : vector<2x8xf32>
    %220 = vector.multi_reduction <maximumf>, %219, %cst_82 [2] : vector<2x8x8xf32> to vector<2x8xf32>
    %221 = vector.shape_cast %220 : vector<2x8xf32> to vector<2x8x1xf32>
    %222 = vector.broadcast %221 : vector<2x8x1xf32> to vector<2x8x8xf32>
    %223 = arith.subf %219, %222 : vector<2x8x8xf32>
    %224 = math.exp %223 : vector<2x8x8xf32>
    %cst_83 = arith.constant dense<0.000000e+00> : vector<2x8xf32>
    %225 = vector.multi_reduction <add>, %224, %cst_83 [2] : vector<2x8x8xf32> to vector<2x8xf32>
    %226 = vector.shape_cast %225 : vector<2x8xf32> to vector<2x8x1xf32>
    %227 = tpu.reciprocal %226 {approx = true} : vector<2x8x1xf32> -> vector<2x8x1xf32>
    %228 = vector.broadcast %227 : vector<2x8x1xf32> to vector<2x8x8xf32>
    %229 = arith.mulf %224, %228 : vector<2x8x8xf32>
    "tpu.trace_start"() <{level = 10 : i32, message = "bqk,bkd->bqd"}> : () -> ()
    %cst_84 = arith.constant dense<0.000000e+00> : vector<2x8x8xf32>
    %230 = tpu.matmul %229, %216, %cst_84 {dimension_numbers = #tpu.dot_dimension_numbers<[2], [1], [1], [2], [0, 0, 0, 1, 1, 2], [0], [0]>} : vector<2x8x8xf32>, vector<2x8x8xf32>, vector<2x8x8xf32> -> vector<2x8x8xf32>
    "tpu.trace_stop"() : () -> ()
    %231 = tpu.concatenate %179, %196, %213, %230 in 2 : vector<2x8x8xf32>, vector<2x8x8xf32>, vector<2x8x8xf32>, vector<2x8x8xf32> -> vector<2x8x32xf32>
    %232 = vector.shape_cast %231 : vector<2x8x32xf32> to vector<16x32xf32>
    %cst_85 = arith.constant dense<0.000000e+00> : vector<16x32xf32>
    %233 = tpu.matmul %232, %6, %cst_85 {dimension_numbers = #tpu.dot_dimension_numbers<[1], [0], [0], [1], [0, 0, 1, 1], [], []>} : vector<16x32xf32>, vector<32x32xf32>, vector<16x32xf32> -> vector<16x32xf32>
    %234 = vector.broadcast %7 : vector<1x32xf32> to vector<16x32xf32>
    %235 = arith.addf %233, %234 : vector<16x32xf32>
    %236 = arith.addf %151, %235 : vector<16x32xf32>
    %cst_86 = arith.constant dense<0.000000e+00> : vector<16xf32>
    %237 = vector.multi_reduction <add>, %236, %cst_86 [1] : vector<16x32xf32> to vector<16xf32>
    %238 = vector.shape_cast %237 : vector<16xf32> to vector<16x1xf32>
    %cst_87 = arith.constant 3.200000e+01 : f32
    %239 = vector.broadcast %cst_87 : f32 to vector<16x1xf32>
    %240 = arith.divf %238, %239 : vector<16x1xf32>
    %241 = vector.broadcast %240 : vector<16x1xf32> to vector<16x32xf32>
    %242 = arith.subf %236, %241 : vector<16x32xf32>
    %243 = arith.mulf %242, %242 : vector<16x32xf32>
    %cst_88 = arith.constant dense<0.000000e+00> : vector<16xf32>
    %244 = vector.multi_reduction <add>, %243, %cst_88 [1] : vector<16x32xf32> to vector<16xf32>
    %245 = vector.shape_cast %244 : vector<16xf32> to vector<16x1xf32>
    %cst_89 = arith.constant 3.200000e+01 : f32
    %246 = vector.broadcast %cst_89 : f32 to vector<16x1xf32>
    %247 = arith.divf %245, %246 : vector<16x1xf32>
    %cst_90 = arith.constant 9.99999974E-6 : f32
    %248 = vector.broadcast %cst_90 : f32 to vector<16x1xf32>
    %249 = arith.addf %247, %248 : vector<16x1xf32>
    %250 = math.rsqrt %249 : vector<16x1xf32>
    %251 = vector.broadcast %250 : vector<16x1xf32> to vector<16x32xf32>
    %252 = arith.mulf %242, %251 : vector<16x32xf32>
    %253 = vector.broadcast %8 : vector<1x32xf32> to vector<16x32xf32>
    %254 = arith.mulf %252, %253 : vector<16x32xf32>
    %255 = vector.broadcast %9 : vector<1x32xf32> to vector<16x32xf32>
    %256 = arith.addf %254, %255 : vector<16x32xf32>
    %cst_91 = arith.constant dense<0.000000e+00> : vector<16x64xf32>
    %257 = tpu.matmul %256, %10, %cst_91 {dimension_numbers = #tpu.dot_dimension_numbers<[1], [0], [0], [1], [0, 0, 1, 1], [], []>} : vector<16x32xf32>, vector<32x64xf32>, vector<16x64xf32> -> vector<16x64xf32>
    %258 = vector.broadcast %11 : vector<1x64xf32> to vector<16x64xf32>
    %259 = arith.addf %257, %258 : vector<16x64xf32>
    %cst_92 = arith.constant 0.000000e+00 : f32
    %260 = vector.broadcast %cst_92 : f32 to vector<16x64xf32>
    %261 = arith.maximumf %259, %260 : vector<16x64xf32>
    %cst_93 = arith.constant dense<0.000000e+00> : vector<16x32xf32>
    %262 = tpu.matmul %261, %12, %cst_93 {dimension_numbers = #tpu.dot_dimension_numbers<[1], [0], [0], [1], [0, 0, 1, 1], [], []>} : vector<16x64xf32>, vector<64x32xf32>, vector<16x32xf32> -> vector<16x32xf32>
    %263 = vector.broadcast %13 : vector<1x32xf32> to vector<16x32xf32>
    %264 = arith.addf %262, %263 : vector<16x32xf32>
    %265 = arith.addf %256, %264 : vector<16x32xf32>
    %cst_94 = arith.constant dense<0.000000e+00> : vector<16xf32>
    %266 = vector.multi_reduction <add>, %265, %cst_94 [1] : vector<16x32xf32> to vector<16xf32>
    %267 = vector.shape_cast %266 : vector<16xf32> to vector<16x1xf32>
    %cst_95 = arith.constant 3.200000e+01 : f32
    %268 = vector.broadcast %cst_95 : f32 to vector<16x1xf32>
    %269 = arith.divf %267, %268 : vector<16x1xf32>
    %270 = vector.broadcast %269 : vector<16x1xf32> to vector<16x32xf32>
    %271 = arith.subf %265, %270 : vector<16x32xf32>
    %272 = arith.mulf %271, %271 : vector<16x32xf32>
    %cst_96 = arith.constant dense<0.000000e+00> : vector<16xf32>
    %273 = vector.multi_reduction <add>, %272, %cst_96 [1] : vector<16x32xf32> to vector<16xf32>
    %274 = vector.shape_cast %273 : vector<16xf32> to vector<16x1xf32>
    %cst_97 = arith.constant 3.200000e+01 : f32
    %275 = vector.broadcast %cst_97 : f32 to vector<16x1xf32>
    %276 = arith.divf %274, %275 : vector<16x1xf32>
    %cst_98 = arith.constant 9.99999974E-6 : f32
    %277 = vector.broadcast %cst_98 : f32 to vector<16x1xf32>
    %278 = arith.addf %276, %277 : vector<16x1xf32>
    %279 = math.rsqrt %278 : vector<16x1xf32>
    %280 = vector.broadcast %279 : vector<16x1xf32> to vector<16x32xf32>
    %281 = arith.mulf %271, %280 : vector<16x32xf32>
    %282 = vector.broadcast %14 : vector<1x32xf32> to vector<16x32xf32>
    %283 = arith.mulf %281, %282 : vector<16x32xf32>
    %284 = vector.broadcast %15 : vector<1x32xf32> to vector<16x32xf32>
    %285 = arith.addf %283, %284 : vector<16x32xf32>
    %286 = vector.shape_cast %285 : vector<16x32xf32> to vector<2x8x32xf32>
    %c0_99 = arith.constant 0 : index
    %c0_100 = arith.constant 0 : index
    %c0_101 = arith.constant 0 : index
    %287 = vector.load %arg15[%c0_99, %c0_100, %c0_101] : memref<2x8x32xf32, #tpu.memory_space<vmem>>, vector<2x8x32xf32>
    tpu.vector_store %arg15[%c0_99, %c0_100, %c0_101], %286 {strides = array<i32>} : memref<2x8x32xf32, #tpu.memory_space<vmem>>, vector<2x8x32xf32>,
    return
  }
  func.func @transform_0(%arg0: i32) -> (i32, i32, i32) {
    %c0_i32 = arith.constant 0 : i32
    %c0_i32_0 = arith.constant 0 : i32
    %c0_i32_1 = arith.constant 0 : i32
    %c0_i32_2 = arith.constant 0 : i32
    return %c0_i32, %c0_i32_0, %c0_i32_1 : i32, i32, i32
  }
  func.func @transform_1(%arg0: i32) -> (i32, i32, i32) {
    %c0_i32 = arith.constant 0 : i32
    %c0_i32_0 = arith.constant 0 : i32
    %c0_i32_1 = arith.constant 0 : i32
    %c0_i32_2 = arith.constant 0 : i32
    return %c0_i32, %c0_i32_0, %c0_i32_1 : i32, i32, i32
  }
  func.func @transform_2(%arg0: i32) -> (i32, i32) {
    %c0_i32 = arith.constant 0 : i32
    %c0_i32_0 = arith.constant 0 : i32
    %c0_i32_1 = arith.constant 0 : i32
    return %c0_i32, %c0_i32_0 : i32, i32
  }
  func.func @transform_3(%arg0: i32) -> (i32, i32) {
    %c0_i32 = arith.constant 0 : i32
    %c0_i32_0 = arith.constant 0 : i32
    %c0_i32_1 = arith.constant 0 : i32
    return %c0_i32, %c0_i32_0 : i32, i32
  }
  func.func @transform_4(%arg0: i32) -> (i32, i32) {
    %c0_i32 = arith.constant 0 : i32
    %c0_i32_0 = arith.constant 0 : i32
    %c0_i32_1 = arith.constant 0 : i32
    return %c0_i32, %c0_i32_0 : i32, i32
  }
  func.func @transform_5(%arg0: i32) -> (i32, i32) {
    %c0_i32 = arith.constant 0 : i32
    %c0_i32_0 = arith.constant 0 : i32
    %c0_i32_1 = arith.constant 0 : i32
    return %c0_i32, %c0_i32_0 : i32, i32
  }
  func.func @transform_6(%arg0: i32) -> (i32, i32) {
    %c0_i32 = arith.constant 0 : i32
    %c0_i32_0 = arith.constant 0 : i32
    %c0_i32_1 = arith.constant 0 : i32
    return %c0_i32, %c0_i32_0 : i32, i32
  }
  func.func @transform_7(%arg0: i32) -> (i32, i32) {
    %c0_i32 = arith.constant 0 : i32
    %c0_i32_0 = arith.constant 0 : i32
    %c0_i32_1 = arith.constant 0 : i32
    return %c0_i32, %c0_i32_0 : i32, i32
  }
  func.func @transform_8(%arg0: i32) -> (i32, i32) {
    %c0_i32 = arith.constant 0 : i32
    %c0_i32_0 = arith.constant 0 : i32
    %c0_i32_1 = arith.constant 0 : i32
    return %c0_i32, %c0_i32_0 : i32, i32
  }
  func.func @transform_9(%arg0: i32) -> (i32, i32) {
    %c0_i32 = arith.constant 0 : i32
    %c0_i32_0 = arith.constant 0 : i32
    %c0_i32_1 = arith.constant 0 : i32
    return %c0_i32, %c0_i32_0 : i32, i32
  }
  func.func @transform_10(%arg0: i32) -> (i32, i32) {
    %c0_i32 = arith.constant 0 : i32
    %c0_i32_0 = arith.constant 0 : i32
    %c0_i32_1 = arith.constant 0 : i32
    return %c0_i32, %c0_i32_0 : i32, i32
  }
  func.func @transform_11(%arg0: i32) -> (i32, i32) {
    %c0_i32 = arith.constant 0 : i32
    %c0_i32_0 = arith.constant 0 : i32
    %c0_i32_1 = arith.constant 0 : i32
    return %c0_i32, %c0_i32_0 : i32, i32
  }
  func.func @transform_12(%arg0: i32) -> (i32, i32) {
    %c0_i32 = arith.constant 0 : i32
    %c0_i32_0 = arith.constant 0 : i32
    %c0_i32_1 = arith.constant 0 : i32
    return %c0_i32, %c0_i32_0 : i32, i32
  }
  func.func @transform_13(%arg0: i32) -> (i32, i32) {
    %c0_i32 = arith.constant 0 : i32
    %c0_i32_0 = arith.constant 0 : i32
    %c0_i32_1 = arith.constant 0 : i32
    return %c0_i32, %c0_i32_0 : i32, i32
  }
  func.func @transform_14(%arg0: i32) -> (i32, i32, i32) {
    %c0_i32 = arith.constant 0 : i32
    %c0_i32_0 = arith.constant 0 : i32
    %c0_i32_1 = arith.constant 0 : i32
    %c0_i32_2 = arith.constant 0 : i32
    return %c0_i32, %c0_i32_0, %c0_i32_1 : i32, i32, i32
  }
}

</mosaic_0001>

<bundles_post_ra>
// kernel: fwd.1
= control target key start
LH: loop header
LB: loop body
LE: loop exit
PB: predicated region body
PF: predicated region fallthrough
CT: control target
= control target key end

     0   :  { %vm95_vm0 = vcmask 261120   ;;  %s4319_s17 = smov 64   ;;  %v4320_v14 = vmov 0.0   ;;  %vm4321_vm1 = vmmov 0   ;;  %s4322_s29 = smov 96   ;;  %vm279_vm2 = vcmask 64512   ;;  %s5096_s2 = inlined_call_operand.vmem [shape: f32[32,96], index: 2, kind: input, shape index: {}]   ;;  %s5097_s1 = inlined_call_operand.vmem [shape: f32[2,8,32], index: 1, kind: input, shape index: {}]   ;;  %s5098_s0 = inlined_call_operand.vmem [shape: f32[2,8,32], index: 0, kind: input, shape index: {}]   ;;  %s5099_s3 = inlined_call_operand.vmem [shape: f32[1,96], index: 3, kind: input, shape index: {}]   ;;  %s5100_s4 = inlined_call_operand.vmem [shape: f32[32,32], index: 4, kind: input, shape index: {}]   ;;  %s5101_s5 = inlined_call_operand.vmem [shape: f32[1,32], index: 5, kind: input, shape index: {}]   ;;  %s5102_s8 = inlined_call_operand.vmem [shape: f32[32,64], index: 8, kind: input, shape index: {}]   ;;  %s5103_s10 = inlined_call_operand.vmem [shape: f32[64,32], index: 10, kind: input, shape index: {}]   ;;  %s5104_s6 = inlined_call_operand.vmem [shape: f32[1,32], index: 6, kind: input, shape index: {}]   ;;  %s5105_s7 = inlined_call_operand.vmem [shape: f32[1,32], index: 7, kind: input, shape index: {}]   ;;  %s5106_s9 = inlined_call_operand.vmem [shape: f32[1,64], index: 9, kind: input, shape index: {}]   ;;  %s5107_s11 = inlined_call_operand.vmem [shape: f32[1,32], index: 11, kind: input, shape index: {}]   ;;  %s5108_s12 = inlined_call_operand.vmem [shape: f32[1,32], index: 12, kind: input, shape index: {}]   ;;  %s5109_s13 = inlined_call_operand.vmem [shape: f32[1,32], index: 13, kind: input, shape index: {}]   ;;  %s5110_s14 = inlined_call_operand.vmem [shape: f32[2,8,32], index: 14, kind: output, shape index: {}]  }
   0x1   :  { %v4413_v0 = vld [vmem:[%s5096_s2 + $0x18] sm:$0xff]  ;;  %v4418_v1 = vld [vmem:[%s5096_s2 + $0x8] sm:$0xff]  ;;  %v4427_v2 = vld [vmem:[%s5096_s2 + $0x10] sm:$0xff]  ;;  %3970 = vmatprep.subr.mxu0 %v4320_v14  ;;  %3972 = vmatprep.mubr.msk.f32.mxu0 %vm4321_vm1, %v4320_v14  ;;  %s4324_s30 = smov 120   ;;  %s4325_s15 = smov 56   ;;  %vm1631_vm3 = vcmask 130048  }
   0x2   :  { %89 = vrot.lane.b32.xlu0 %v4413_v0, %s4319_s17  ;;  %85 = vrot.lane.b32.xlu1 %v4418_v1, %s4319_s17  ;;  %v4432_v3 = vld [vmem:[%s5096_s2] sm:$0xff]  ;;  %v4455_v11 = vld [vmem:[%s5097_s1 + $0x8] sm:$0xff]  ;;  %s4326_s16 = smov 80   ;;  %s4327_s18 = smov 112   ;;  %vm1634_vm4 = vcmask 195584   ;;  %vm1864_vm5 = vcmask 523264  }
   0x3   :  { %v4437_v4 = vld [vmem:[%s5097_s1] sm:$0xff]  ;;  %v4463_v12 = vld [vmem:[%s5098_s0 + $0x8] sm:$0xff]  ;;  %s4328_s19 = smov 48   ;;  %s4329_s20 = smov 72  }
   0x4   :  { %3956 = vmatprep.mubr.msk.f32.mxu1 %vm95_vm0, %v4437_v4  ;;  %v4448_v8 = vld [vmem:[%s5098_s0] sm:$0xff]  ;;  %v178_v13 = vadd.f32 %v4455_v11, %v4463_v12  ;;  %s4330_s21 = smov 104   ;;  %s4331_s22 = smov 40  }
   0x5   :  { %v177_v10 = vadd.f32 %v4437_v4, %v4448_v8  ;;  %v4485_v17 = vld [vmem:[%s5099_s3] ss:$0 sm:$0xff]  ;;  %s4323_s3 = smov 88   ;;  %s4332_s23 = smov 8  }
   0x6   :  { %87 = vrot.lane.b32.xlu0 %v4427_v2, %s4319_s17  ;;  %83 = vrot.lane.b32.xlu1 %v4432_v3, %s4319_s17  ;;  %s4333_s2 = smov 16   ;;  %s4334_s25 = smov 24  }
  0x74   :  { %v90_v5 = vpop.permute.xlu0 %89  ;;  %v86_v6 = vpop.permute.xlu1 %85 }
  0x75   :  { %3948 = vmatprep.subr.mxu1 %v90_v5 }
  0x76   :  { %3949 = vmatpush3.msra.mxu1 %v90_v5 }
  0x78   :  { %v88_v7 = vpop.permute.xlu0 %87  ;;  %v84_v9 = vpop.permute.xlu1 %83 }
  0x79   :  { %3950 = vmatprep.subr.mxu1 %v88_v7 }
  0x7a   :  { %3951 = vmatpush3.msra.mxu1 %v88_v7 }
  0x7b   :  { %3952 = vmatprep.subr.mxu1 %v86_v6 }
  0x7c   :  { %3953 = vmatpush3.msra.mxu1 %v86_v6 }
  0x7d   :  { %3954 = vmatprep.subr.mxu1 %v84_v9 }
  0x7e   :  { %3955 = vmatpush3.msra.mxu1 %v84_v9 }
  0x7f   :  { %3957 = vmatmul.mubr.msk.f32.vlgmr.msra.gmra.mxu1 %vm95_vm0, %v4455_v11  ;;  %3959 = vmatprep.subr.mxu1 %v4413_v0 }
  0x80   :  { %3960 = vmatpush3.msra.mxu1 %v4413_v0  ;;  %3967 = vmatprep.mubr.msk.f32.mxu1 %vm95_vm0, %v177_v10 }
  0x81   :  { %3961 = vmatprep.subr.mxu1 %v4427_v2 }
  0x82   :  { %3962 = vmatpush3.msra.mxu1 %v4427_v2 }
  0x83   :  { %3963 = vmatprep.subr.mxu1 %v4418_v1 }
  0x84   :  { %3964 = vmatpush3.msra.mxu1 %v4418_v1 }
  0x85   :  { %3965 = vmatprep.subr.mxu1 %v4432_v3 }
  0x86   :  { %3966 = vmatpush3.msra.mxu1 %v4432_v3 }
  0x87   :  { %3968 = vmatmul.mubr.msk.f32.vlgmr.msra.gmra.mxu1 %vm95_vm0, %v178_v13  ;;  %3975 = vmatprep.subr.mxu1 %v4320_v14 }
  0x88   :  { %3977 = vmatprep.mubr.msk.f32.mxu1 %vm4321_vm1, %v4320_v14 }
 0x13f   :  { %v3958_v15 = vpop.f32.mrf.mxu1 }
 0x141   :  { %v168_v16 = vpop.f32.mrf.mxu1 }
 0x147   :  { %v3969_v18 = vpop.f32.mrf.mxu1 }
 0x148   :  { %v4488_v19 = vadd.f32 %v3969_v18, %v4485_v17 }
 0x149   :  { %v257_v20 = vpop.f32.mrf.mxu1 }
 0x14a   :  { %v4491_v21 = vadd.f32 %v4485_v17, %v257_v20  ;;  %355 = vrot.lane.b32.xlu1 %v4488_v19, %s4322_s29 }
 0x14c   :  { %277 = vrot.lane.b32.xlu0 %v4491_v21, %s4322_s29 }
 0x1bc   :  { %v356_v22 = vpop.permute.xlu1 %355 }
 0x1bd   :  { %3976 = vmatpush3.xpose.msk.msra.mxu1 %vm279_vm2, %v356_v22 }
 0x1be   :  { %v278_v23 = vpop.permute.xlu0 %277  ;;  %3985 = vmatprep.subr.mxu1 %v4320_v14 }
 0x1bf   :  { %3971 = vmatpush3.xpose.msk.msra.mxu0 %vm279_vm2, %v278_v23 }
 0x1c0   :  { %3978 = vmatmul.mubr.msk.f32.vlgmr.msra.gmra.mxu1 %vm279_vm2, %v4488_v19  ;;  %3980 = vmatprep.subr.mxu0 %v4320_v14 }
 0x1c1   :  { %3987 = vmatprep.mubr.msk.f32.mxu1 %vm4321_vm1, %v4320_v14 }
 0x1c2   :  { %3973 = vmatmul.mubr.msk.f32.vlgmr.msra.gmra.mxu0 %vm279_vm2, %v4491_v21 }
 0x1c3   :  { %3982 = vmatprep.mubr.msk.f32.mxu0 %vm4321_vm1, %v4320_v14 }
 0x280   :  { %v427_v24 = vpop.f32.mrf.mxu1 }
 0x281   :  { %v432_v25 = vmul.f32 0.35355338, %v427_v24 }
 0x282   :  { %v350_v26 = vpop.f32.mrf.mxu0  ;;  %v3979_v27 = vpop.f32.mrf.mxu1 }
 0x283   :  { %v431_v28 = vmul.f32 0.35355338, %v350_v26  ;;  %v436_v29 = vsel %vm279_vm2, %v432_v25, -inf }
 0x284   :  { %437 = vmax.xlane.f32.xlu1 %v436_v29  ;;  %v3974_v30 = vpop.f32.mrf.mxu0 }
 0x285   :  { %v433_v31 = vsel %vm279_vm2, %v431_v28, -inf }
 0x286   :  { %434 = vmax.xlane.f32.xlu0 %v433_v31 }
 0x295   :  { %270 = vrot.lane.b32.xlu1 %v3958_v15, %s4319_s17 }
 0x29c   :  { %268 = vrot.lane.b32.xlu0 %v168_v16, %s4319_s17 }
 0x30d   :  { %v438_v32 = vpop.xlane.xlu1 %437 }
 0x30e   :  { %v440_v39 = vsub.f32 %v432_v25, %v438_v32 }
 0x30f   :  { %v435_v33 = vpop.xlane.xlu0 %434 }
 0x310   :  { %v439_v38 = vsub.f32 %v431_v28, %v435_v33  ;;  %v443_v41 = vmul.f32 1.442695, %v440_v39 }
 0x311   :  { %v4513_v34 = vpop.permute.xlu1 %270 }
 0x312   :  { %v4517_v35 = vsub.f32 %v4488_v19, %v4513_v34  ;;  %v441_v40 = vmul.f32 1.442695, %v439_v38 }
 0x313   :  { %v4519_v36 = vpop.permute.xlu0 %268 }
 0x314   :  { %v4523_v37 = vsub.f32 %v4491_v21, %v4519_v36  ;;  %533 = vrot.lane.b32.xlu1 %v4517_v35, %s4319_s17  ;;  %4239 = vpow2.f32 %v441_v40 }
 0x315   :  { %4241 = vpow2.f32 %v443_v41 }
 0x316   :  { %456 = vrot.lane.b32.xlu0 %v4523_v37, %s4319_s17 }
 0x321   :  { %v4240_v42 = vpop.eup %4239 }
 0x322   :  { %v4242_v43 = vpop.eup %4241  ;;  %v445_v44 = vsel %vm279_vm2, %v4240_v42, 0.0 }
 0x323   :  { %v448_v45 = vsel %vm279_vm2, %v4242_v43, 0.0 }
 0x335   :  { %446 = vadd.xlane.f32.xlu0 %v445_v44 }
 0x338   :  { %449 = vadd.xlane.f32.xlu1 %v448_v45 }
 0x349   :  { %689 = vrot.lane.b32.xlu1 %v4488_v19, %s4323_s3 }
 0x34b   :  { %611 = vrot.lane.b32.xlu0 %v4491_v21, %s4323_s3 }
 0x34d   :  { %687 = vrot.lane.b32.xlu1 %v4488_v19, %s4324_s30 }
 0x34f   :  { %609 = vrot.lane.b32.xlu0 %v4491_v21, %s4324_s30 }
 0x386   :  { %v534_v46 = vpop.permute.xlu1 %533 }
 0x387   :  { %3986 = vmatpush3.msra.mxu1 %v534_v46 }
 0x388   :  { %v457_v47 = vpop.permute.xlu0 %456  ;;  %3995 = vmatprep.subr.mxu1 %v4320_v14 }
 0x389   :  { %3981 = vmatpush3.msra.mxu0 %v457_v47 }
 0x38a   :  { %3990 = vmatprep.subr.mxu0 %v4320_v14 }
 0x3be   :  { %v447_v48 = vpop.xlane.xlu0 %446 }
 0x3bf   :  { %4243 = vrcp.f32 %v447_v48 }
 0x3c1   :  { %v450_v49 = vpop.xlane.xlu1 %449 }
 0x3c2   :  { %4245 = vrcp.f32 %v450_v49  ;;  %v612_v51 = vpop.permute.xlu0 %611 }
 0x3c5   :  { %v690_v54 = vpop.permute.xlu1 %689 }
 0x3c6   :  { %v610_v56 = vpop.permute.xlu0 %609 }
 0x3c9   :  { %v688_v57 = vpop.permute.xlu1 %687 }
 0x3cc   :  { %v4244_v50 = vpop.eup %4243 }
 0x3cd   :  { %v453_v52 = vmul.f32 %v4244_v50, %v4240_v42 }
 0x3cf   :  { %v4246_v53 = vpop.eup %4245  ;;  %3983 = vmatmul.mubr.msk.f32.vlgmr.msra.gmra.mxu0 %vm279_vm2, %v453_v52 }
 0x3d0   :  { %3991 = vmatpush3.xpose.msk.msra.mxu0 %vm279_vm2, %v612_v51  ;;  %v454_v55 = vmul.f32 %v4246_v53, %v4242_v43  ;;  %3992 = vmatprep.mubr.msk.f32.mxu0 %vm4321_vm1, %v4320_v14 }
 0x3d1   :  { %4000 = vmatprep.subr.mxu0 %v4320_v14 }
 0x3d2   :  { %3988 = vmatmul.mubr.msk.f32.vlgmr.msra.gmra.mxu1 %vm279_vm2, %v454_v55 }
 0x3d3   :  { %3996 = vmatpush3.xpose.msk.msra.mxu1 %vm279_vm2, %v690_v54  ;;  %3993 = vmatmul.mubr.msk.f32.vlgmr.msra.gmra.mxu0 %vm279_vm2, %v610_v56 }
 0x3d4   :  { %3997 = vmatprep.mubr.msk.f32.mxu1 %vm4321_vm1, %v4320_v14  ;;  %4005 = vmatprep.subr.mxu1 %v4320_v14 }
 0x3d5   :  { %4002 = vmatprep.mubr.msk.f32.mxu0 %vm4321_vm1, %v4320_v14 }
 0x3d6   :  { %3998 = vmatmul.mubr.msk.f32.vlgmr.msra.gmra.mxu1 %vm279_vm2, %v688_v57 }
 0x3d7   :  { %4007 = vmatprep.mubr.msk.f32.mxu1 %vm4321_vm1, %v4320_v14 }
 0x48f   :  { %v4557_v58 = vpop.f32.mrf.mxu0 }
 0x491   :  { %v3984_v59 = vpop.f32.mrf.mxu0 }
 0x492   :  { %v4559_v60 = vpop.f32.mrf.mxu1 }
 0x493   :  { %v683_v61 = vpop.f32.mrf.mxu0 }
 0x494   :  { %v765_v62 = vmul.f32 0.35355338, %v683_v61  ;;  %v3989_v63 = vpop.f32.mrf.mxu1 }
 0x495   :  { %v3994_v5 = vpop.f32.mrf.mxu0 }
 0x496   :  { %v761_v6 = vpop.f32.mrf.mxu1  ;;  %v767_v7 = vsel %vm279_vm2, %v765_v62, -inf }
 0x497   :  { %v766_v9 = vmul.f32 0.35355338, %v761_v6  ;;  %768 = vmax.xlane.f32.xlu0 %v767_v7 }
 0x498   :  { %v3999_v10 = vpop.f32.mrf.mxu1 }
 0x499   :  { %v770_v13 = vsel %vm279_vm2, %v766_v9, -inf }
 0x49a   :  { %771 = vmax.xlane.f32.xlu1 %v770_v13 }
 0x4ab   :  { %789 = vrot.lane.b32.xlu1 %v4523_v37, %s4325_s15 }
 0x4af   :  { %943 = vrot.lane.b32.xlu1 %v4491_v21, %s4326_s16 }
 0x4b3   :  { %1021 = vrot.lane.b32.xlu1 %v4488_v19, %s4326_s16 }
 0x4b7   :  { %1019 = vrot.lane.b32.xlu1 %v4488_v19, %s4327_s18 }
 0x520   :  { %v769_v15 = vpop.xlane.xlu0 %768 }
 0x521   :  { %v773_v16 = vsub.f32 %v765_v62, %v769_v15 }
 0x523   :  { %v772_v18 = vpop.xlane.xlu1 %771  ;;  %v775_v22 = vmul.f32 1.442695, %v773_v16 }
 0x524   :  { %v774_v20 = vsub.f32 %v766_v9, %v772_v18 }
 0x526   :  { %v777_v23 = vmul.f32 1.442695, %v774_v20 }
 0x527   :  { %v790_v24 = vpop.permute.xlu1 %789 }
 0x528   :  { %4247 = vpow2.f32 %v777_v23  ;;  %4001 = vmatpush3.msra.mxu0 %v790_v24 }
 0x529   :  { %4010 = vmatprep.subr.mxu0 %v4320_v14  ;;  %4249 = vpow2.f32 %v775_v22 }
 0x52b   :  { %v944_v31 = vpop.permute.xlu1 %943 }
 0x52f   :  { %v1022_v38 = vpop.permute.xlu1 %1021 }
 0x533   :  { %v1020_v42 = vpop.permute.xlu1 %1019 }
 0x535   :  { %v4248_v25 = vpop.eup %4247 }
 0x536   :  { %v782_v26 = vsel %vm279_vm2, %v4248_v25, 0.0  ;;  %v4250_v27 = vpop.eup %4249 }
 0x537   :  { %783 = vadd.xlane.f32.xlu0 %v782_v26  ;;  %v779_v28 = vsel %vm279_vm2, %v4250_v27, 0.0 }
 0x53b   :  { %780 = vadd.xlane.f32.xlu0 %v779_v28 }
 0x551   :  { %865 = vrot.lane.b32.xlu0 %v4517_v35, %s4325_s15 }
 0x555   :  { %941 = vrot.lane.b32.xlu0 %v4491_v21, %s4327_s18 }
 0x5c0   :  { %v784_v29 = vpop.xlane.xlu0 %783 }
 0x5c1   :  { %4251 = vrcp.f32 %v784_v29 }
 0x5c4   :  { %v781_v30 = vpop.xlane.xlu0 %780 }
 0x5c5   :  { %4253 = vrcp.f32 %v781_v30 }
 0x5c8   :  { %v866_v32 = vpop.permute.xlu0 %865 }
 0x5c9   :  { %4006 = vmatpush3.msra.mxu1 %v866_v32 }
 0x5ca   :  { %4015 = vmatprep.subr.mxu1 %v4320_v14 }
 0x5cc   :  { %v942_v43 = vpop.permute.xlu0 %941 }
 0x5ce   :  { %v4252_v33 = vpop.eup %4251 }
 0x5cf   :  { %v788_v39 = vmul.f32 %v4252_v33, %v4248_v25 }
 0x5d1   :  { %4008 = vmatmul.mubr.msk.f32.vlgmr.msra.gmra.mxu1 %vm279_vm2, %v788_v39 }
 0x5d2   :  { %v4254_v40 = vpop.eup %4253  ;;  %4016 = vmatpush3.xpose.msk.msra.mxu1 %vm279_vm2, %v1022_v38  ;;  %4017 = vmatprep.mubr.msk.f32.mxu1 %vm4321_vm1, %v4320_v14 }
 0x5d3   :  { %v787_v41 = vmul.f32 %v4254_v40, %v4250_v27  ;;  %4025 = vmatprep.subr.mxu1 %v4320_v14 }
 0x5d5   :  { %4003 = vmatmul.mubr.msk.f32.vlgmr.msra.gmra.mxu0 %vm279_vm2, %v787_v41  ;;  %4018 = vmatmul.mubr.msk.f32.vlgmr.msra.gmra.mxu1 %vm279_vm2, %v1020_v42 }
 0x5d6   :  { %4011 = vmatpush3.xpose.msk.msra.mxu0 %vm279_vm2, %v944_v31  ;;  %4012 = vmatprep.mubr.msk.f32.mxu0 %vm4321_vm1, %v4320_v14 }
 0x5d7   :  { %4020 = vmatprep.subr.mxu0 %v4320_v14  ;;  %4027 = vmatprep.mubr.msk.f32.mxu1 %vm4321_vm1, %v4320_v14 }
 0x5d9   :  { %4013 = vmatmul.mubr.msk.f32.vlgmr.msra.gmra.mxu0 %vm279_vm2, %v942_v43 }
 0x5da   :  { %4022 = vmatprep.mubr.msk.f32.mxu0 %vm4321_vm1, %v4320_v14 }
 0x691   :  { %v4595_v44 = vpop.f32.mrf.mxu1 }
 0x693   :  { %v4009_v45 = vpop.f32.mrf.mxu1 }
 0x695   :  { %v4597_v46 = vpop.f32.mrf.mxu0  ;;  %v1093_v47 = vpop.f32.mrf.mxu1 }
 0x696   :  { %v1098_v48 = vmul.f32 0.35355338, %v1093_v47 }
 0x697   :  { %v4004_v49 = vpop.f32.mrf.mxu0  ;;  %v4019_v50 = vpop.f32.mrf.mxu1 }
 0x698   :  { %v1102_v51 = vsel %vm279_vm2, %v1098_v48, -inf }
 0x699   :  { %1103 = vmax.xlane.f32.xlu1 %v1102_v51  ;;  %v1015_v52 = vpop.f32.mrf.mxu0 }
 0x69a   :  { %v1097_v53 = vmul.f32 0.35355338, %v1015_v52 }
 0x69b   :  { %v4014_v54 = vpop.f32.mrf.mxu0 }
 0x69c   :  { %v1099_v55 = vsel %vm279_vm2, %v1097_v53, -inf }
 0x69d   :  { %1100 = vmax.xlane.f32.xlu0 %v1099_v55 }
 0x6aa   :  { %1121 = vrot.lane.b32.xlu1 %v4523_v37, %s4328_s19 }
 0x6ae   :  { %1275 = vrot.lane.b32.xlu1 %v4491_v21, %s4329_s20 }
 0x6b2   :  { %1353 = vrot.lane.b32.xlu1 %v4488_v19, %s4329_s20 }
 0x6b6   :  { %1351 = vrot.lane.b32.xlu1 %v4488_v19, %s4330_s21 }
 0x722   :  { %v1104_v56 = vpop.xlane.xlu1 %1103 }
 0x723   :  { %v1106_v57 = vsub.f32 %v1098_v48, %v1104_v56 }
 0x725   :  { %v1109_v59 = vmul.f32 1.442695, %v1106_v57 }
 0x726   :  { %v1122_v61 = vpop.permute.xlu1 %1121  ;;  %v1101_v62 = vpop.xlane.xlu0 %1100 }
 0x727   :  { %4255 = vpow2.f32 %v1109_v59  ;;  %v1105_v63 = vsub.f32 %v1097_v53, %v1101_v62  ;;  %4021 = vmatpush3.msra.mxu0 %v1122_v61  ;;  %v4659_v61 = vld [vmem:[%s5100_s4 + $0x10] sm:$0xff]  ;;  %v4664_v62 = vld [vmem:[%s5100_s4 + $0x8] sm:$0xff] }
 0x728   :  { %4030 = vmatprep.subr.mxu0 %v4320_v14 }
 0x729   :  { %v1107_v5 = vmul.f32 1.442695, %v1105_v63  ;;  %v4673_v63 = vld [vmem:[%s5100_s4] sm:$0xff] }
 0x72a   :  { %v1276_v15 = vpop.permute.xlu1 %1275 }
 0x72b   :  { %4257 = vpow2.f32 %v1107_v5 }
 0x72e   :  { %v1354_v20 = vpop.permute.xlu1 %1353 }
 0x732   :  { %v1352_v24 = vpop.permute.xlu1 %1351 }
 0x734   :  { %v4256_v6 = vpop.eup %4255 }
 0x735   :  { %v1114_v7 = vsel %vm279_vm2, %v4256_v6, 0.0 }
 0x736   :  { %1115 = vadd.xlane.f32.xlu0 %v1114_v7 }
 0x738   :  { %v4258_v9 = vpop.eup %4257 }
 0x739   :  { %v1111_v10 = vsel %vm279_vm2, %v4258_v9, 0.0 }
 0x73a   :  { %1112 = vadd.xlane.f32.xlu0 %v1111_v10 }
 0x750   :  { %1197 = vrot.lane.b32.xlu0 %v4517_v35, %s4328_s19 }
 0x754   :  { %1273 = vrot.lane.b32.xlu0 %v4491_v21, %s4330_s21 }
 0x7bf   :  { %v1116_v19 = vpop.xlane.xlu0 %1115 }
 0x7c0   :  { %4259 = vrcp.f32 %v1116_v19 }
 0x7c3   :  { %v1113_v13 = vpop.xlane.xlu0 %1112 }
 0x7c4   :  { %4261 = vrcp.f32 %v1113_v13 }
 0x7c7   :  { %v1198_v16 = vpop.permute.xlu0 %1197 }
 0x7c8   :  { %4026 = vmatpush3.msra.mxu1 %v1198_v16 }
 0x7c9   :  { %4035 = vmatprep.subr.mxu1 %v4320_v14 }
 0x7cb   :  { %v1274_v25 = vpop.permute.xlu0 %1273 }
 0x7cd   :  { %v4260_v18 = vpop.eup %4259 }
 0x7ce   :  { %v1120_v22 = vmul.f32 %v4260_v18, %v4256_v6 }
 0x7d0   :  { %4028 = vmatmul.mubr.msk.f32.vlgmr.msra.gmra.mxu1 %vm279_vm2, %v1120_v22 }
 0x7d1   :  { %v4262_v23 = vpop.eup %4261  ;;  %4036 = vmatpush3.xpose.msk.msra.mxu1 %vm279_vm2, %v1354_v20  ;;  %4037 = vmatprep.mubr.msk.f32.mxu1 %vm4321_vm1, %v4320_v14 }
 0x7d2   :  { %v1119_v21 = vmul.f32 %v4262_v23, %v4258_v9  ;;  %4045 = vmatprep.subr.mxu1 %v4320_v14 }
 0x7d4   :  { %4023 = vmatmul.mubr.msk.f32.vlgmr.msra.gmra.mxu0 %vm279_vm2, %v1119_v21  ;;  %4038 = vmatmul.mubr.msk.f32.vlgmr.msra.gmra.mxu1 %vm279_vm2, %v1352_v24 }
 0x7d5   :  { %4031 = vmatpush3.xpose.msk.msra.mxu0 %vm279_vm2, %v1276_v15  ;;  %4032 = vmatprep.mubr.msk.f32.mxu0 %vm4321_vm1, %v4320_v14 }
 0x7d6   :  { %4040 = vmatprep.subr.mxu0 %v4320_v14  ;;  %4047 = vmatprep.mubr.msk.f32.mxu1 %vm4321_vm1, %v4320_v14 }
 0x7d8   :  { %4033 = vmatmul.mubr.msk.f32.vlgmr.msra.gmra.mxu0 %vm279_vm2, %v1274_v25 }
 0x7d9   :  { %4042 = vmatprep.mubr.msk.f32.mxu0 %vm4321_vm1, %v4320_v14 }
 0x890   :  { %v1269_v26 = vpop.f32.mrf.mxu1 }
 0x892   :  { %v4029_v27 = vpop.f32.mrf.mxu1 }
 0x894   :  { %v1193_v28 = vpop.f32.mrf.mxu0  ;;  %v1425_v29 = vpop.f32.mrf.mxu1 }
 0x895   :  { %v1430_v30 = vmul.f32 0.35355338, %v1425_v29 }
 0x896   :  { %v4024_v31 = vpop.f32.mrf.mxu0  ;;  %v4039_v32 = vpop.f32.mrf.mxu1 }
 0x897   :  { %v1434_v33 = vsel %vm279_vm2, %v1430_v30, -inf }
 0x898   :  { %1435 = vmax.xlane.f32.xlu1 %v1434_v33  ;;  %v1347_v38 = vpop.f32.mrf.mxu0 }
 0x899   :  { %v1429_v39 = vmul.f32 0.35355338, %v1347_v38 }
 0x89a   :  { %v4034_v40 = vpop.f32.mrf.mxu0 }
 0x89b   :  { %v1431_v41 = vsel %vm279_vm2, %v1429_v39, -inf }
 0x89c   :  { %1432 = vmax.xlane.f32.xlu0 %v1431_v41 }
 0x8a9   :  { %1453 = vrot.lane.b32.xlu1 %v4523_v37, %s4331_s22 }
 0x8ad   :  { %1607 = vrot.lane.b32.xlu1 %v4597_v46, %s4332_s23 }
 0x8b1   :  { %1609 = vrot.lane.b32.xlu1 %v4595_v44, %s4332_s23 }
 0x8b5   :  { %1617 = vrot.lane.b32.xlu1 %v1269_v26, %s4333_s2 }
 0x921   :  { %v1436_v42 = vpop.xlane.xlu1 %1435 }
 0x922   :  { %v1438_v43 = vsub.f32 %v1430_v30, %v1436_v42 }
 0x924   :  { %v1441_v45 = vmul.f32 1.442695, %v1438_v43 }
 0x925   :  { %v1454_v47 = vpop.permute.xlu1 %1453  ;;  %v1433_v48 = vpop.xlane.xlu0 %1432 }
 0x926   :  { %4263 = vpow2.f32 %v1441_v45  ;;  %v1437_v49 = vsub.f32 %v1429_v39, %v1433_v48  ;;  %4041 = vmatpush3.msra.mxu0 %v1454_v47  ;;  %v4712_v48 = vld [vmem:[%s5102_s8 + $0x10] sm:$0xff] }
 0x928   :  { %v1439_v50 = vmul.f32 1.442695, %v1437_v49  ;;  %v4717_v49 = vld [vmem:[%s5102_s8 + $0x8] sm:$0xff] }
 0x929   :  { %v1608_v10 = vpop.permute.xlu1 %1607 }
 0x92a   :  { %4265 = vpow2.f32 %v1439_v50  ;;  %v1629_v16 = vsel %vm279_vm2, %v4557_v58, %v1608_v10  ;;  %v4692_v58 = vld [vmem:[%s5101_s5] ss:$0 sm:$0xff] }
 0x92b   :  { %v4724_v50 = vld [vmem:[%s5102_s8] sm:$0xff] }
 0x92d   :  { %v1610_v19 = vpop.permute.xlu1 %1609 }
 0x92e   :  { %v1630_v20 = vsel %vm279_vm2, %v4559_v60, %v1610_v19 }
 0x931   :  { %v1618_v13 = vpop.permute.xlu1 %1617 }
 0x932   :  { %v1633_v21 = vsel %vm1631_vm3, %v1630_v20, %v1618_v13 }
 0x933   :  { %v4264_v37 = vpop.eup %4263 }
 0x934   :  { %v1446_v51 = vsel %vm279_vm2, %v4264_v37, 0.0 }
 0x935   :  { %1447 = vadd.xlane.f32.xlu0 %v1446_v51  ;;  %v4738_v51 = vld [vmem:[%s5103_s10 + $0x30] sm:$0xff] }
 0x937   :  { %v4266_v46 = vpop.eup %4265 }
 0x938   :  { %v1443_v44 = vsel %vm279_vm2, %v4266_v46, 0.0 }
 0x939   :  { %1444 = vadd.xlane.f32.xlu0 %v1443_v44  ;;  %v4753_v44 = vld [vmem:[%s5103_s10 + $0x20] sm:$0xff] }
 0x94f   :  { %1529 = vrot.lane.b32.xlu0 %v4517_v35, %s4331_s22  ;;  %v4652_v35 = vld [vmem:[%s5100_s4 + $0x18] sm:$0xff] }
 0x950   :  { %4050 = vmatprep.subr.mxu0 %v4652_v35 }
 0x953   :  { %1615 = vrot.lane.b32.xlu0 %v1193_v28, %s4333_s2 }
 0x9be   :  { %v1448_v52 = vpop.xlane.xlu0 %1447 }
 0x9bf   :  { %4267 = vrcp.f32 %v1448_v52 }
 0x9c2   :  { %v1445_v53 = vpop.xlane.xlu0 %1444 }
 0x9c3   :  { %4269 = vrcp.f32 %v1445_v53 }
 0x9c6   :  { %v1530_v54 = vpop.permute.xlu0 %1529 }
 0x9c7   :  { %4046 = vmatpush3.msra.mxu1 %v1530_v54 }
 0x9ca   :  { %v1616_v15 = vpop.permute.xlu0 %1615 }
 0x9cb   :  { %v1632_v22 = vsel %vm1631_vm3, %v1629_v16, %v1616_v15 }
 0x9cc   :  { %v4268_v55 = vpop.eup %4267 }
 0x9cd   :  { %v1452_v56 = vmul.f32 %v4268_v55, %v4264_v37  ;;  %v4733_v37 = vld [vmem:[%s5103_s10 + $0x38] sm:$0xff] }
 0x9cf   :  { %4048 = vmatmul.mubr.msk.f32.vlgmr.msra.gmra.mxu1 %vm279_vm2, %v1452_v56 }
 0x9d0   :  { %v4270_v57 = vpop.eup %4269 }
 0x9d1   :  { %v1451_v59 = vmul.f32 %v4270_v57, %v4266_v46  ;;  %v4746_v46 = vld [vmem:[%s5103_s10 + $0x28] sm:$0xff] }
 0x9d3   :  { %4043 = vmatmul.mubr.msk.f32.vlgmr.msra.gmra.mxu0 %vm279_vm2, %v1451_v59 }
 0x9d4   :  { %4051 = vmatpush3.msra.mxu0 %v4652_v35 }
 0x9d5   :  { %4052 = vmatprep.subr.mxu0 %v4659_v61 }
 0x9d6   :  { %4053 = vmatpush3.msra.mxu0 %v4659_v61 }
 0x9d7   :  { %4054 = vmatprep.subr.mxu0 %v4664_v62 }
 0x9d8   :  { %4055 = vmatpush3.msra.mxu0 %v4664_v62 }
 0x9d9   :  { %4056 = vmatprep.subr.mxu0 %v4673_v63 }
 0x9da   :  { %4057 = vmatpush3.msra.mxu0 %v4673_v63 }
 0x9db   :  { %4072 = vmatprep.subr.mxu0 %v4733_v37 }
 0xa8f   :  { %v1601_v5 = vpop.f32.mrf.mxu1 }
 0xa90   :  { %1625 = vrot.lane.b32.xlu1 %v1601_v5, %s4334_s25  ;;  %v4762_v5 = vld [vmem:[%s5104_s6] ss:$0 sm:$0xff] }
 0xa91   :  { %v4049_v6 = vpop.f32.mrf.mxu1 }
 0xa93   :  { %v1525_v7 = vpop.f32.mrf.mxu0 }
 0xa94   :  { %1623 = vrot.lane.b32.xlu0 %v1525_v7, %s4334_s25  ;;  %v4767_v7 = vld [vmem:[%s5105_s7] ss:$0 sm:$0xff] }
 0xa95   :  { %v4044_v9 = vpop.f32.mrf.mxu0 }
 0xb02   :  { %v1626_v18 = vpop.permute.xlu1 %1625 }
 0xb03   :  { %v1636_v25 = vsel %vm1634_vm4, %v1633_v21, %v1626_v18  ;;  %v4786_v18 = vld [vmem:[%s5103_s10 + $0x18] sm:$0xff] }
 0xb06   :  { %v1624_v23 = vpop.permute.xlu0 %1623 }
 0xb07   :  { %v1635_v24 = vsel %vm1634_vm4, %v1632_v22, %v1624_v23 }
 0xb08   :  { %4058 = vmatprep.mubr.msk.f32.mxu0 %vm95_vm0, %v1635_v24 }
 0xb09   :  { %4059 = vmatmul.mubr.msk.f32.vlgmr.msra.gmra.mxu0 %vm95_vm0, %v1636_v25 }
 0xb0a   :  { %4073 = vmatpush3.msra.mxu0 %v4733_v37 }
 0xb0b   :  { %4074 = vmatprep.subr.mxu0 %v4738_v51 }
 0xb0c   :  { %4075 = vmatpush3.msra.mxu0 %v4738_v51 }
 0xb0d   :  { %4076 = vmatprep.subr.mxu0 %v4746_v46 }
 0xb0e   :  { %4077 = vmatpush3.msra.mxu0 %v4746_v46 }
 0xb0f   :  { %4078 = vmatprep.subr.mxu0 %v4753_v44 }
 0xb10   :  { %4079 = vmatpush3.msra.mxu0 %v4753_v44 }
 0xb11   :  { %4080 = vmatprep.subr.mxu0 %v4786_v18 }
 0xb12   :  { %4081 = vmatpush3.msra.mxu0 %v4786_v18 }
 0xbc9   :  { %v4060_v26 = vpop.f32.mrf.mxu0 }
 0xbca   :  { %v1721_v60 = vadd.f32 %v4060_v26, %v4692_v58  ;;  %v4826_v26 = vld [vmem:[%s5107_s11] ss:$0 sm:$0xff] }
 0xbcb   :  { %v1715_v27 = vpop.f32.mrf.mxu0 }
 0xbcc   :  { %v1716_v28 = vadd.f32 %v4692_v58, %v1715_v27  ;;  %v1725_v29 = vadd.f32 %v1721_v60, %v4463_v12 }
 0xbce   :  { %v1729_v30 = vsel %vm95_vm0, %v1725_v29, 0.0  ;;  %v1724_v31 = vadd.f32 %v1716_v28, %v4448_v8  ;;  %v4705_v8 = vld [vmem:[%s5102_s8 + $0x18] sm:$0xff] }
 0xbcf   :  { %1730 = vadd.xlane.f32.xlu1 %v1729_v30  ;;  %4061 = vmatprep.subr.mxu1 %v4705_v8 }
 0xbd0   :  { %v1726_v32 = vsel %vm95_vm0, %v1724_v31, 0.0  ;;  %4062 = vmatpush3.msra.mxu1 %v4705_v8 }
 0xbd1   :  { %1727 = vadd.xlane.f32.xlu0 %v1726_v32  ;;  %4063 = vmatprep.subr.mxu1 %v4712_v48 }
 0xbd2   :  { %4064 = vmatpush3.msra.mxu1 %v4712_v48 }
 0xbd3   :  { %4065 = vmatprep.subr.mxu1 %v4717_v49 }
 0xbd4   :  { %4066 = vmatpush3.msra.mxu1 %v4717_v49 }
 0xbd5   :  { %4067 = vmatprep.subr.mxu1 %v4724_v50 }
 0xbd6   :  { %4068 = vmatpush3.msra.mxu1 %v4724_v50 }
 0xbd7   :  { %4091 = vmatprep.subr.mxu1 %v4413_v0 }
 0xc58   :  { %v1731_v33 = vpop.xlane.xlu1 %1730 }
 0xc59   :  { %v1734_v38 = vmul.f32 0.03125, %v1731_v33 }
 0xc5a   :  { %v1728_v39 = vpop.xlane.xlu0 %1727 }
 0xc5b   :  { %v1733_v40 = vmul.f32 0.03125, %v1728_v39  ;;  %v1736_v41 = vsub.f32 %v1725_v29, %v1734_v38 }
 0xc5d   :  { %v1735_v42 = vsub.f32 %v1724_v31, %v1733_v40  ;;  %v1738_v47 = vmul.f32 %v1736_v41, %v1736_v41 }
 0xc5f   :  { %v1737_v43 = vmul.f32 %v1735_v42, %v1735_v42  ;;  %v1742_v12 = vsel %vm95_vm0, %v1738_v47, 0.0 }
 0xc61   :  { %v1739_v45 = vsel %vm95_vm0, %v1737_v43, 0.0 }
 0xc62   :  { %1740 = vadd.xlane.f32.xlu0 %v1739_v45 }
 0xc66   :  { %1743 = vadd.xlane.f32.xlu0 %v1742_v12 }
 0xceb   :  { %v1741_v52 = vpop.xlane.xlu0 %1740 }
 0xcec   :  { %v1745_v53 = vmul.f32 0.03125, %v1741_v52 }
 0xcee   :  { %v1747_v54 = vadd.f32 1e-05, %v1745_v53 }
 0xcef   :  { %v1744_v55 = vpop.xlane.xlu0 %1743 }
 0xcf0   :  { %4271 = vrsqrt.f32 %v1747_v54  ;;  %v1746_v56 = vmul.f32 0.03125, %v1744_v55 }
 0xcf2   :  { %v1748_v57 = vadd.f32 1e-05, %v1746_v56 }
 0xcf4   :  { %4273 = vrsqrt.f32 %v1748_v57 }
 0xcfd   :  { %v4272_v59 = vpop.eup %4271 }
 0xcfe   :  { %v1751_v6 = vmul.f32 %v4272_v59, %v1735_v42 }
 0xd00   :  { %v1759_v9 = vmul.f32 %v4762_v5, %v1751_v6 }
 0xd01   :  { %v4274_v10 = vpop.eup %4273 }
 0xd02   :  { %v1752_v19 = vmul.f32 %v4274_v10, %v1736_v41  ;;  %v1767_v13 = vadd.f32 %v4767_v7, %v1759_v9  ;;  %v4837_v9 = vld [vmem:[%s5108_s12] ss:$0 sm:$0xff] }
 0xd04   :  { %4069 = vmatprep.mubr.msk.f32.mxu1 %vm95_vm0, %v1767_v13  ;;  %v1760_v15 = vmul.f32 %v4762_v5, %v1752_v19 }
 0xd06   :  { %v1768_v16 = vadd.f32 %v4767_v7, %v1760_v15 }
 0xd08   :  { %4070 = vmatmul.mubr.msk.f32.vlgmr.msra.gmra.mxu1 %vm95_vm0, %v1768_v16 }
 0xd09   :  { %4092 = vmatpush3.msra.mxu1 %v4413_v0  ;;  %v4793_v0 = vld [vmem:[%s5103_s10 + $0x10] sm:$0xff] }
 0xd0a   :  { %4093 = vmatprep.subr.mxu1 %v4427_v2  ;;  %4082 = vmatprep.subr.mxu0 %v4793_v0 }
 0xd0b   :  { %4094 = vmatpush3.msra.mxu1 %v4427_v2  ;;  %4083 = vmatpush3.msra.mxu0 %v4793_v0  ;;  %v4806_v2 = vld [vmem:[%s5103_s10] sm:$0xff] }
 0xd0c   :  { %4095 = vmatprep.subr.mxu1 %v4418_v1 }
 0xd0d   :  { %4096 = vmatpush3.msra.mxu1 %v4418_v1  ;;  %v4800_v1 = vld [vmem:[%s5103_s10 + $0x8] sm:$0xff] }
 0xd0e   :  { %4097 = vmatprep.subr.mxu1 %v4432_v3  ;;  %4084 = vmatprep.subr.mxu0 %v4800_v1 }
 0xd0f   :  { %4098 = vmatpush3.msra.mxu1 %v4432_v3  ;;  %4085 = vmatpush3.msra.mxu0 %v4800_v1  ;;  %v4815_v3 = vld [vmem:[%s5106_s9] ss:$0 sm:$0xff] }
 0xd10   :  { %4102 = vmatprep.subr.mxu1 %v4320_v14  ;;  %4086 = vmatprep.subr.mxu0 %v4806_v2 }
 0xd11   :  { %4087 = vmatpush3.msra.mxu0 %v4806_v2 }
 0xd12   :  { %4112 = vmatprep.subr.mxu0 %v4320_v14 }
 0xdc8   :  { %v4071_v20 = vpop.f32.mrf.mxu1 }
 0xdc9   :  { %v1853_v22 = vadd.f32 %v4071_v20, %v4815_v3 }
 0xdca   :  { %v1847_v23 = vpop.f32.mrf.mxu1 }
 0xdcb   :  { %v1848_v21 = vadd.f32 %v4815_v3, %v1847_v23  ;;  %v1857_v25 = vmax.f32 %v1853_v22, 0.0 }
 0xdcd   :  { %v1856_v24 = vmax.f32 %v1848_v21, 0.0 }
 0xdcf   :  { %4088 = vmatprep.mubr.msk.f32.mxu0 %vm1864_vm5, %v1856_v24 }
 0xdd0   :  { %4089 = vmatmul.mubr.msk.f32.vlgmr.msra.gmra.mxu0 %vm1864_vm5, %v1857_v25 }
 0xdd1   :  { %4114 = vmatprep.mubr.msk.f32.mxu0 %vm4321_vm1, %v4320_v14 }
 0xe90   :  { %v4090_v60 = vpop.f32.mrf.mxu0 }
 0xe91   :  { %v1943_v27 = vadd.f32 %v4090_v60, %v4826_v26 }
 0xe92   :  { %v1937_v28 = vpop.f32.mrf.mxu0 }
 0xe93   :  { %v1938_v29 = vadd.f32 %v4826_v26, %v1937_v28  ;;  %v1947_v30 = vadd.f32 %v1943_v27, %v1768_v16 }
 0xe95   :  { %v1951_v31 = vsel %vm95_vm0, %v1947_v30, 0.0  ;;  %v1946_v32 = vadd.f32 %v1938_v29, %v1767_v13  ;;  %v4842_v13 = vld [vmem:[%s5109_s13] ss:$0 sm:$0xff] }
 0xe96   :  { %1952 = vadd.xlane.f32.xlu0 %v1951_v31 }
 0xe97   :  { %v1948_v33 = vsel %vm95_vm0, %v1946_v32, 0.0 }
 0xe98   :  { %1949 = vadd.xlane.f32.xlu1 %v1948_v33 }
 0xf1f   :  { %v1953_v38 = vpop.xlane.xlu0 %1952 }
 0xf20   :  { %v1955_v39 = vmul.f32 0.03125, %v1953_v38 }
 0xf21   :  { %v1950_v40 = vpop.xlane.xlu1 %1949 }
 0xf22   :  { %v1957_v41 = vsub.f32 %v1947_v30, %v1955_v39  ;;  %v1954_v42 = vmul.f32 0.03125, %v1950_v40 }
 0xf24   :  { %v1956_v43 = vsub.f32 %v1946_v32, %v1954_v42  ;;  %v1959_v45 = vmul.f32 %v1957_v41, %v1957_v41 }
 0xf26   :  { %v1963_v47 = vsel %vm95_vm0, %v1959_v45, 0.0  ;;  %v1958_v12 = vmul.f32 %v1956_v43, %v1956_v43 }
 0xf27   :  { %1964 = vadd.xlane.f32.xlu0 %v1963_v47 }
 0xf28   :  { %v1960_v52 = vsel %vm95_vm0, %v1958_v12, 0.0 }
 0xf29   :  { %1961 = vadd.xlane.f32.xlu1 %v1960_v52 }
 0xfb0   :  { %v1965_v53 = vpop.xlane.xlu0 %1964 }
 0xfb1   :  { %v1967_v54 = vmul.f32 0.03125, %v1965_v53 }
 0xfb2   :  { %v1962_v55 = vpop.xlane.xlu1 %1961 }
 0xfb3   :  { %v1969_v56 = vadd.f32 1e-05, %v1967_v54  ;;  %v1966_v57 = vmul.f32 0.03125, %v1962_v55 }
 0xfb5   :  { %4275 = vrsqrt.f32 %v1969_v56  ;;  %v1968_v59 = vadd.f32 1e-05, %v1966_v57 }
 0xfb7   :  { %4277 = vrsqrt.f32 %v1968_v59 }
 0xfc2   :  { %v4276_v6 = vpop.eup %4275 }
 0xfc3   :  { %v1973_v10 = vmul.f32 %v4276_v6, %v1957_v41 }
 0xfc4   :  { %v4278_v19 = vpop.eup %4277 }
 0xfc5   :  { %v1972_v15 = vmul.f32 %v4278_v19, %v1956_v43  ;;  %v1981_v16 = vmul.f32 %v4837_v9, %v1973_v10 }
 0xfc7   :  { %v1980_v20 = vmul.f32 %v4837_v9, %v1972_v15  ;;  %v4847_v22 = vadd.f32 %v4842_v13, %v1981_v16 }
 0xfc9   :  { %v4850_v23 = vadd.f32 %v4842_v13, %v1980_v20  ;;  %v1991_v24 = vadd.f32 %v4847_v22, %v4455_v11 }
 0xfcb   :  { %v1990_v21 = vadd.f32 %v4850_v23, %v4437_v4 }
 0xfcd   :  { %4099 = vmatprep.mubr.msk.f32.mxu1 %vm95_vm0, %v1990_v21 }
 0xfce   :  { %4100 = vmatmul.mubr.msk.f32.vlgmr.msra.gmra.mxu1 %vm95_vm0, %v1991_v24 }
 0xfcf   :  { %4104 = vmatprep.mubr.msk.f32.mxu1 %vm4321_vm1, %v4320_v14 }
0x108e   :  { %v4101_v25 = vpop.f32.mrf.mxu1 }
0x108f   :  { %v4861_v60 = vadd.f32 %v4101_v25, %v4485_v17 }
0x1090   :  { %v2064_v27 = vpop.f32.mrf.mxu1 }
0x1091   :  { %v4864_v28 = vadd.f32 %v4485_v17, %v2064_v27  ;;  %2153 = vrot.lane.b32.xlu0 %v4861_v60, %s4322_s29  ;;  %v4894_v41 = vsub.f32 %v4861_v60, %v4513_v34 }
0x1093   :  { %2076 = vrot.lane.b32.xlu1 %v4864_v28, %s4322_s29  ;;  %v4886_v40 = vsub.f32 %v4864_v28, %v4519_v36 }
0x1103   :  { %v2154_v11 = vpop.permute.xlu0 %2153 }
0x1105   :  { %v2077_v4 = vpop.permute.xlu1 %2076 }
0x1106   :  { %4103 = vmatpush3.xpose.msk.msra.mxu1 %vm279_vm2, %v2077_v4 }
0x1107   :  { %4107 = vmatprep.subr.mxu1 %v4320_v14 }
0x1109   :  { %4105 = vmatmul.mubr.msk.f32.vlgmr.msra.gmra.mxu1 %vm279_vm2, %v4864_v28 }
0x110a   :  { %4108 = vmatpush3.xpose.msk.msra.mxu1 %vm279_vm2, %v2154_v11  ;;  %4109 = vmatprep.mubr.msk.f32.mxu1 %vm4321_vm1, %v4320_v14 }
0x110b   :  { %4117 = vmatprep.subr.mxu1 %v4320_v14 }
0x110d   :  { %4110 = vmatmul.mubr.msk.f32.vlgmr.msra.gmra.mxu1 %vm279_vm2, %v4861_v60 }
0x110e   :  { %4119 = vmatprep.mubr.msk.f32.mxu1 %vm4321_vm1, %v4320_v14 }
0x11c9   :  { %v2148_v17 = vpop.f32.mrf.mxu1 }
0x11ca   :  { %v2229_v29 = vmul.f32 0.35355338, %v2148_v17 }
0x11cb   :  { %v4106_v30 = vpop.f32.mrf.mxu1 }
0x11cc   :  { %v2231_v31 = vsel %vm279_vm2, %v2229_v29, -inf }
0x11cd   :  { %2232 = vmax.xlane.f32.xlu1 %v2231_v31  ;;  %v2225_v32 = vpop.f32.mrf.mxu1 }
0x11ce   :  { %v2230_v33 = vmul.f32 0.35355338, %v2225_v32 }
0x11cf   :  { %v4111_v38 = vpop.f32.mrf.mxu1 }
0x11d0   :  { %v2234_v39 = vsel %vm279_vm2, %v2230_v33, -inf }
0x11d1   :  { %2235 = vmax.xlane.f32.xlu0 %v2234_v39 }
0x11de   :  { %2254 = vrot.lane.b32.xlu1 %v4886_v40, %s4319_s17 }
0x11e2   :  { %2409 = vrot.lane.b32.xlu1 %v4864_v28, %s4323_s3 }
0x11e6   :  { %2487 = vrot.lane.b32.xlu1 %v4861_v60, %s4323_s3 }
0x11e7   :  { %2331 = vrot.lane.b32.xlu0 %v4894_v41, %s4319_s17 }
0x1256   :  { %v2233_v42 = vpop.xlane.xlu1 %2232 }
0x1257   :  { %v2237_v43 = vsub.f32 %v2229_v29, %v2233_v42 }
0x1259   :  { %v2239_v36 = vmul.f32 1.442695, %v2237_v43 }
0x125a   :  { %v2236_v45 = vpop.xlane.xlu0 %2235  ;;  %v2255_v47 = vpop.permute.xlu1 %2254 }
0x125b   :  { %4279 = vpow2.f32 %v2239_v36  ;;  %v2238_v12 = vsub.f32 %v2230_v33, %v2236_v45  ;;  %4113 = vmatpush3.msra.mxu0 %v2255_v47 }
0x125c   :  { %4122 = vmatprep.subr.mxu0 %v4320_v14 }
0x125d   :  { %v2241_v52 = vmul.f32 1.442695, %v2238_v12 }
0x125e   :  { %v2332_v53 = vpop.permute.xlu0 %2331  ;;  %v2410_v57 = vpop.permute.xlu1 %2409 }
0x125f   :  { %4281 = vpow2.f32 %v2241_v52  ;;  %4118 = vmatpush3.msra.mxu1 %v2332_v53 }
0x1260   :  { %4127 = vmatprep.subr.mxu1 %v4320_v14 }
0x1262   :  { %v2488_v59 = vpop.permute.xlu1 %2487 }
0x1268   :  { %v4280_v34 = vpop.eup %4279 }
0x1269   :  { %v2243_v54 = vsel %vm279_vm2, %v4280_v34, 0.0 }
0x126a   :  { %2244 = vadd.xlane.f32.xlu1 %v2243_v54 }
0x126c   :  { %v4282_v55 = vpop.eup %4281 }
0x126d   :  { %v2246_v56 = vsel %vm279_vm2, %v4282_v55, 0.0 }
0x126e   :  { %2247 = vadd.xlane.f32.xlu0 %v2246_v56 }
0x127b   :  { %2485 = vrot.lane.b32.xlu1 %v4861_v60, %s4324_s30 }
0x1284   :  { %2407 = vrot.lane.b32.xlu0 %v4864_v28, %s4324_s30 }
0x12f3   :  { %v2245_v6 = vpop.xlane.xlu1 %2244 }
0x12f4   :  { %4283 = vrcp.f32 %v2245_v6 }
0x12f7   :  { %v2248_v10 = vpop.xlane.xlu0 %2247  ;;  %v2486_v24 = vpop.permute.xlu1 %2485 }
0x12f8   :  { %4285 = vrcp.f32 %v2248_v10 }
0x12fb   :  { %v2408_v21 = vpop.permute.xlu0 %2407 }
0x1301   :  { %v4284_v19 = vpop.eup %4283 }
0x1302   :  { %v2251_v15 = vmul.f32 %v4284_v19, %v4280_v34 }
0x1304   :  { %4115 = vmatmul.mubr.msk.f32.vlgmr.msra.gmra.mxu0 %vm279_vm2, %v2251_v15 }
0x1305   :  { %v4286_v16 = vpop.eup %4285  ;;  %4123 = vmatpush3.xpose.msk.msra.mxu0 %vm279_vm2, %v2410_v57  ;;  %4124 = vmatprep.mubr.msk.f32.mxu0 %vm4321_vm1, %v4320_v14 }
0x1306   :  { %v2252_v20 = vmul.f32 %v4286_v16, %v4282_v55  ;;  %4132 = vmatprep.subr.mxu0 %v4320_v14 }
0x1308   :  { %4120 = vmatmul.mubr.msk.f32.vlgmr.msra.gmra.mxu1 %vm279_vm2, %v2252_v20  ;;  %4125 = vmatmul.mubr.msk.f32.vlgmr.msra.gmra.mxu0 %vm279_vm2, %v2408_v21 }
0x1309   :  { %4128 = vmatpush3.xpose.msk.msra.mxu1 %vm279_vm2, %v2488_v59  ;;  %4129 = vmatprep.mubr.msk.f32.mxu1 %vm4321_vm1, %v4320_v14 }
0x130a   :  { %4137 = vmatprep.subr.mxu1 %v4320_v14  ;;  %4134 = vmatprep.mubr.msk.f32.mxu0 %vm4321_vm1, %v4320_v14 }
0x130c   :  { %4130 = vmatmul.mubr.msk.f32.vlgmr.msra.gmra.mxu1 %vm279_vm2, %v2486_v24 }
0x130d   :  { %4139 = vmatprep.mubr.msk.f32.mxu1 %vm4321_vm1, %v4320_v14 }
0x13c4   :  { %v4924_v25 = vpop.f32.mrf.mxu0 }
0x13c6   :  { %v4116_v27 = vpop.f32.mrf.mxu0 }
0x13c8   :  { %v4926_v4 = vpop.f32.mrf.mxu1  ;;  %v2481_v11 = vpop.f32.mrf.mxu0 }
0x13c9   :  { %v2563_v17 = vmul.f32 0.35355338, %v2481_v11 }
0x13ca   :  { %v4121_v29 = vpop.f32.mrf.mxu1  ;;  %v4126_v30 = vpop.f32.mrf.mxu0 }
0x13cb   :  { %v2565_v31 = vsel %vm279_vm2, %v2563_v17, -inf }
0x13cc   :  { %2566 = vmax.xlane.f32.xlu0 %v2565_v31  ;;  %v2559_v32 = vpop.f32.mrf.mxu1 }
0x13cd   :  { %v2564_v33 = vmul.f32 0.35355338, %v2559_v32 }
0x13ce   :  { %v4131_v38 = vpop.f32.mrf.mxu1 }
0x13cf   :  { %v2568_v39 = vsel %vm279_vm2, %v2564_v33, -inf }
0x13d0   :  { %2569 = vmax.xlane.f32.xlu1 %v2568_v39 }
0x13e1   :  { %2587 = vrot.lane.b32.xlu1 %v4886_v40, %s4325_s15 }
0x13e2   :  { %2663 = vrot.lane.b32.xlu0 %v4894_v41, %s4325_s15 }
0x13e5   :  { %2741 = vrot.lane.b32.xlu1 %v4864_v28, %s4326_s16 }
0x13e9   :  { %2819 = vrot.lane.b32.xlu1 %v4861_v60, %s4326_s16 }
0x13ed   :  { %2817 = vrot.lane.b32.xlu1 %v4861_v60, %s4327_s18 }
0x1455   :  { %v2567_v42 = vpop.xlane.xlu0 %2566 }
0x1456   :  { %v2571_v43 = vsub.f32 %v2563_v17, %v2567_v42 }
0x1458   :  { %v2573_v36 = vmul.f32 1.442695, %v2571_v43 }
0x1459   :  { %v2664_v45 = vpop.permute.xlu0 %2663  ;;  %v2570_v47 = vpop.xlane.xlu1 %2569 }
0x145a   :  { %4287 = vpow2.f32 %v2573_v36  ;;  %v2572_v12 = vsub.f32 %v2564_v33, %v2570_v47  ;;  %4138 = vmatpush3.msra.mxu1 %v2664_v45 }
0x145b   :  { %4147 = vmatprep.subr.mxu1 %v4320_v14 }
0x145c   :  { %v2575_v52 = vmul.f32 1.442695, %v2572_v12 }
0x145d   :  { %v2588_v53 = vpop.permute.xlu1 %2587 }
0x145e   :  { %4289 = vpow2.f32 %v2575_v52  ;;  %4133 = vmatpush3.msra.mxu0 %v2588_v53 }
0x145f   :  { %4142 = vmatprep.subr.mxu0 %v4320_v14 }
0x1461   :  { %v2742_v6 = vpop.permute.xlu1 %2741 }
0x1465   :  { %v2820_v16 = vpop.permute.xlu1 %2819 }
0x1467   :  { %v4288_v34 = vpop.eup %4287 }
0x1468   :  { %v2577_v54 = vsel %vm279_vm2, %v4288_v34, 0.0 }
0x1469   :  { %2578 = vadd.xlane.f32.xlu0 %v2577_v54  ;;  %v2818_v24 = vpop.permute.xlu1 %2817 }
0x146b   :  { %v4290_v55 = vpop.eup %4289 }
0x146c   :  { %v2580_v56 = vsel %vm279_vm2, %v4290_v55, 0.0 }
0x146d   :  { %2581 = vadd.xlane.f32.xlu0 %v2580_v56 }
0x1483   :  { %2739 = vrot.lane.b32.xlu0 %v4864_v28, %s4327_s18 }
0x14f2   :  { %v2579_v57 = vpop.xlane.xlu0 %2578 }
0x14f3   :  { %4291 = vrcp.f32 %v2579_v57 }
0x14f6   :  { %v2582_v59 = vpop.xlane.xlu0 %2581 }
0x14f7   :  { %4293 = vrcp.f32 %v2582_v59 }
0x14fa   :  { %v2740_v21 = vpop.permute.xlu0 %2739 }
0x1500   :  { %v4292_v10 = vpop.eup %4291 }
0x1501   :  { %v2585_v19 = vmul.f32 %v4292_v10, %v4288_v34 }
0x1503   :  { %4135 = vmatmul.mubr.msk.f32.vlgmr.msra.gmra.mxu0 %vm279_vm2, %v2585_v19 }
0x1504   :  { %v4294_v15 = vpop.eup %4293  ;;  %4143 = vmatpush3.xpose.msk.msra.mxu0 %vm279_vm2, %v2742_v6  ;;  %4144 = vmatprep.mubr.msk.f32.mxu0 %vm4321_vm1, %v4320_v14 }
0x1505   :  { %v2586_v20 = vmul.f32 %v4294_v15, %v4290_v55  ;;  %4152 = vmatprep.subr.mxu0 %v4320_v14 }
0x1507   :  { %4140 = vmatmul.mubr.msk.f32.vlgmr.msra.gmra.mxu1 %vm279_vm2, %v2586_v20  ;;  %4145 = vmatmul.mubr.msk.f32.vlgmr.msra.gmra.mxu0 %vm279_vm2, %v2740_v21 }
0x1508   :  { %4148 = vmatpush3.xpose.msk.msra.mxu1 %vm279_vm2, %v2820_v16  ;;  %4149 = vmatprep.mubr.msk.f32.mxu1 %vm4321_vm1, %v4320_v14 }
0x1509   :  { %4157 = vmatprep.subr.mxu1 %v4320_v14  ;;  %4154 = vmatprep.mubr.msk.f32.mxu0 %vm4321_vm1, %v4320_v14 }
0x150b   :  { %4150 = vmatmul.mubr.msk.f32.vlgmr.msra.gmra.mxu1 %vm279_vm2, %v2818_v24 }
0x150c   :  { %4159 = vmatprep.mubr.msk.f32.mxu1 %vm4321_vm1, %v4320_v14 }
0x15c3   :  { %v4962_v27 = vpop.f32.mrf.mxu0 }
0x15c5   :  { %v4136_v11 = vpop.f32.mrf.mxu0 }
0x15c7   :  { %v4964_v17 = vpop.f32.mrf.mxu1  ;;  %v2813_v29 = vpop.f32.mrf.mxu0 }
0x15c8   :  { %v2895_v30 = vmul.f32 0.35355338, %v2813_v29 }
0x15c9   :  { %v4141_v31 = vpop.f32.mrf.mxu1  ;;  %v4146_v32 = vpop.f32.mrf.mxu0 }
0x15ca   :  { %v2897_v33 = vsel %vm279_vm2, %v2895_v30, -inf }
0x15cb   :  { %2898 = vmax.xlane.f32.xlu0 %v2897_v33  ;;  %v2891_v38 = vpop.f32.mrf.mxu1 }
0x15cc   :  { %v2896_v39 = vmul.f32 0.35355338, %v2891_v38 }
0x15cd   :  { %v4151_v42 = vpop.f32.mrf.mxu1 }
0x15ce   :  { %v2900_v43 = vsel %vm279_vm2, %v2896_v39, -inf }
0x15cf   :  { %2901 = vmax.xlane.f32.xlu1 %v2900_v43 }
0x15e0   :  { %2919 = vrot.lane.b32.xlu1 %v4886_v40, %s4328_s19 }
0x15e1   :  { %2995 = vrot.lane.b32.xlu0 %v4894_v41, %s4328_s19 }
0x15e4   :  { %3073 = vrot.lane.b32.xlu1 %v4864_v28, %s4329_s20 }
0x15e8   :  { %3151 = vrot.lane.b32.xlu1 %v4861_v60, %s4329_s20 }
0x15ec   :  { %3149 = vrot.lane.b32.xlu1 %v4861_v60, %s4330_s21 }
0x1654   :  { %v2899_v36 = vpop.xlane.xlu0 %2898 }
0x1655   :  { %v2903_v45 = vsub.f32 %v2895_v30, %v2899_v36 }
0x1657   :  { %v2905_v47 = vmul.f32 1.442695, %v2903_v45 }
0x1658   :  { %v2996_v12 = vpop.permute.xlu0 %2995  ;;  %v2902_v52 = vpop.xlane.xlu1 %2901 }
0x1659   :  { %4295 = vpow2.f32 %v2905_v47  ;;  %v2904_v53 = vsub.f32 %v2896_v39, %v2902_v52  ;;  %4158 = vmatpush3.msra.mxu1 %v2996_v12 }
0x165a   :  { %4167 = vmatprep.subr.mxu1 %v4320_v14 }
0x165b   :  { %v2907_v34 = vmul.f32 1.442695, %v2904_v53 }
0x165c   :  { %v2920_v54 = vpop.permute.xlu1 %2919 }
0x165d   :  { %4297 = vpow2.f32 %v2907_v34  ;;  %4153 = vmatpush3.msra.mxu0 %v2920_v54 }
0x165e   :  { %4162 = vmatprep.subr.mxu0 %v4320_v14 }
0x1660   :  { %v3074_v10 = vpop.permute.xlu1 %3073 }
0x1664   :  { %v3152_v20 = vpop.permute.xlu1 %3151 }
0x1666   :  { %v4296_v55 = vpop.eup %4295 }
0x1667   :  { %v2909_v56 = vsel %vm279_vm2, %v4296_v55, 0.0 }
0x1668   :  { %2910 = vadd.xlane.f32.xlu0 %v2909_v56  ;;  %v3150_v24 = vpop.permute.xlu1 %3149 }
0x166a   :  { %v4298_v60 = vpop.eup %4297 }
0x166b   :  { %v2912_v57 = vsel %vm279_vm2, %v4298_v60, 0.0 }
0x166c   :  { %2913 = vadd.xlane.f32.xlu0 %v2912_v57 }
0x1682   :  { %3071 = vrot.lane.b32.xlu0 %v4864_v28, %s4330_s21 }
0x16f1   :  { %v2911_v59 = vpop.xlane.xlu0 %2910 }
0x16f2   :  { %4299 = vrcp.f32 %v2911_v59 }
0x16f5   :  { %v2914_v6 = vpop.xlane.xlu0 %2913 }
0x16f6   :  { %4301 = vrcp.f32 %v2914_v6 }
0x16f9   :  { %v3072_v28 = vpop.permute.xlu0 %3071 }
0x16ff   :  { %v4300_v19 = vpop.eup %4299 }
0x1700   :  { %v2917_v15 = vmul.f32 %v4300_v19, %v4296_v55 }
0x1702   :  { %4155 = vmatmul.mubr.msk.f32.vlgmr.msra.gmra.mxu0 %vm279_vm2, %v2917_v15 }
0x1703   :  { %v4302_v16 = vpop.eup %4301  ;;  %4163 = vmatpush3.xpose.msk.msra.mxu0 %vm279_vm2, %v3074_v10  ;;  %4164 = vmatprep.mubr.msk.f32.mxu0 %vm4321_vm1, %v4320_v14 }
0x1704   :  { %v2918_v21 = vmul.f32 %v4302_v16, %v4298_v60  ;;  %4172 = vmatprep.subr.mxu0 %v4320_v14 }
0x1706   :  { %4160 = vmatmul.mubr.msk.f32.vlgmr.msra.gmra.mxu1 %vm279_vm2, %v2918_v21  ;;  %4165 = vmatmul.mubr.msk.f32.vlgmr.msra.gmra.mxu0 %vm279_vm2, %v3072_v28 }
0x1707   :  { %4168 = vmatpush3.xpose.msk.msra.mxu1 %vm279_vm2, %v3152_v20  ;;  %4169 = vmatprep.mubr.msk.f32.mxu1 %vm4321_vm1, %v4320_v14 }
0x1708   :  { %4177 = vmatprep.subr.mxu1 %v4320_v14  ;;  %4174 = vmatprep.mubr.msk.f32.mxu0 %vm4321_vm1, %v4320_v14 }
0x170a   :  { %4170 = vmatmul.mubr.msk.f32.vlgmr.msra.gmra.mxu1 %vm279_vm2, %v3150_v24 }
0x170b   :  { %4179 = vmatprep.mubr.msk.f32.mxu1 %vm4321_vm1, %v4320_v14 }
0x17c2   :  { %v2991_v11 = vpop.f32.mrf.mxu0 }
0x17c4   :  { %v4156_v29 = vpop.f32.mrf.mxu0 }
0x17c6   :  { %v3067_v30 = vpop.f32.mrf.mxu1  ;;  %v3145_v31 = vpop.f32.mrf.mxu0 }
0x17c7   :  { %v3227_v32 = vmul.f32 0.35355338, %v3145_v31 }
0x17c8   :  { %v4161_v33 = vpop.f32.mrf.mxu1  ;;  %v4166_v38 = vpop.f32.mrf.mxu0 }
0x17c9   :  { %v3229_v39 = vsel %vm279_vm2, %v3227_v32, -inf }
0x17ca   :  { %3230 = vmax.xlane.f32.xlu0 %v3229_v39  ;;  %v3223_v42 = vpop.f32.mrf.mxu1 }
0x17cb   :  { %v3228_v43 = vmul.f32 0.35355338, %v3223_v42 }
0x17cc   :  { %v4171_v36 = vpop.f32.mrf.mxu1 }
0x17cd   :  { %v3232_v45 = vsel %vm279_vm2, %v3228_v43, -inf }
0x17ce   :  { %3233 = vmax.xlane.f32.xlu1 %v3232_v45 }
0x17df   :  { %3251 = vrot.lane.b32.xlu1 %v4886_v40, %s4331_s22 }
0x17e3   :  { %3405 = vrot.lane.b32.xlu1 %v4962_v27, %s4332_s23 }
0x17e7   :  { %3407 = vrot.lane.b32.xlu1 %v4964_v17, %s4332_s23 }
0x17eb   :  { %3415 = vrot.lane.b32.xlu1 %v3067_v30, %s4333_s2 }
0x1853   :  { %v3231_v14 = vpop.xlane.xlu0 %3230 }
0x1854   :  { %v3235_v47 = vsub.f32 %v3227_v32, %v3231_v14 }
0x1856   :  { %v3237_v12 = vmul.f32 1.442695, %v3235_v47 }
0x1857   :  { %v3234_v52 = vpop.xlane.xlu1 %3233 }
0x1858   :  { %4303 = vpow2.f32 %v3237_v12  ;;  %v3236_v53 = vsub.f32 %v3228_v43, %v3234_v52 }
0x185a   :  { %v3239_v34 = vmul.f32 1.442695, %v3236_v53 }
0x185b   :  { %v3252_v54 = vpop.permute.xlu1 %3251 }
0x185c   :  { %4305 = vpow2.f32 %v3239_v34  ;;  %4173 = vmatpush3.msra.mxu0 %v3252_v54 }
0x185d   :  { %4182 = vmatprep.subr.mxu0 %v4652_v35 }
0x1865   :  { %v4304_v40 = vpop.eup %4303 }
0x1866   :  { %v3241_v27 = vsel %vm279_vm2, %v4304_v40, 0.0 }
0x1867   :  { %3242 = vadd.xlane.f32.xlu0 %v3241_v27 }
0x1869   :  { %v4306_v55 = vpop.eup %4305 }
0x186a   :  { %v3244_v17 = vsel %vm279_vm2, %v4306_v55, 0.0 }
0x186b   :  { %3245 = vadd.xlane.f32.xlu0 %v3244_v17 }
0x1881   :  { %3327 = vrot.lane.b32.xlu0 %v4894_v41, %s4331_s22 }
0x1885   :  { %3413 = vrot.lane.b32.xlu0 %v2991_v11, %s4333_s2 }
0x18f0   :  { %v3243_v56 = vpop.xlane.xlu0 %3242 }
0x18f1   :  { %4307 = vrcp.f32 %v3243_v56 }
0x18f4   :  { %v3246_v60 = vpop.xlane.xlu0 %3245 }
0x18f5   :  { %4309 = vrcp.f32 %v3246_v60 }
0x18f8   :  { %v3328_v57 = vpop.permute.xlu0 %3327 }
0x18f9   :  { %4178 = vmatpush3.msra.mxu1 %v3328_v57 }
0x18fa   :  { %4193 = vmatprep.subr.mxu1 %v4705_v8 }
0x18fc   :  { %v3414_v41 = vpop.permute.xlu0 %3413 }
0x18fe   :  { %v4308_v59 = vpop.eup %4307 }
0x18ff   :  { %v3249_v6 = vmul.f32 %v4308_v59, %v4304_v40 }
0x1901   :  { %4175 = vmatmul.mubr.msk.f32.vlgmr.msra.gmra.mxu0 %vm279_vm2, %v3249_v6 }
0x1902   :  { %v4310_v10 = vpop.eup %4309  ;;  %4183 = vmatpush3.msra.mxu0 %v4652_v35 }
0x1903   :  { %v3250_v19 = vmul.f32 %v4310_v10, %v4306_v55  ;;  %4184 = vmatprep.subr.mxu0 %v4659_v61 }
0x1904   :  { %4185 = vmatpush3.msra.mxu0 %v4659_v61 }
0x1905   :  { %4180 = vmatmul.mubr.msk.f32.vlgmr.msra.gmra.mxu1 %vm279_vm2, %v3250_v19  ;;  %4186 = vmatprep.subr.mxu0 %v4664_v62 }
0x1906   :  { %4187 = vmatpush3.msra.mxu0 %v4664_v62  ;;  %4194 = vmatpush3.msra.mxu1 %v4705_v8  ;;  %v3406_v8 = vpop.permute.xlu1 %3405 }
0x1907   :  { %4188 = vmatprep.subr.mxu0 %v4673_v63  ;;  %4195 = vmatprep.subr.mxu1 %v4712_v48  ;;  %v3427_v15 = vsel %vm279_vm2, %v4924_v25, %v3406_v8 }
0x1908   :  { %4189 = vmatpush3.msra.mxu0 %v4673_v63  ;;  %4196 = vmatpush3.msra.mxu1 %v4712_v48 }
0x1909   :  { %4197 = vmatprep.subr.mxu1 %v4717_v49  ;;  %4204 = vmatprep.subr.mxu0 %v4733_v37 }
0x190a   :  { %4198 = vmatpush3.msra.mxu1 %v4717_v49  ;;  %v3408_v48 = vpop.permute.xlu1 %3407  ;;  %v3429_v49 = vsel %vm1631_vm3, %v3427_v15, %v3414_v41 }
0x190b   :  { %4199 = vmatprep.subr.mxu1 %v4724_v50  ;;  %v3428_v21 = vsel %vm279_vm2, %v4926_v4, %v3408_v48 }
0x190c   :  { %4200 = vmatpush3.msra.mxu1 %v4724_v50 }
0x190e   :  { %v3416_v16 = vpop.permute.xlu1 %3415 }
0x190f   :  { %v3430_v28 = vsel %vm1631_vm3, %v3428_v21, %v3416_v16 }
0x19c1   :  { %v3323_v35 = vpop.f32.mrf.mxu0 }
0x19c2   :  { %3421 = vrot.lane.b32.xlu0 %v3323_v35, %s4334_s25 }
0x19c3   :  { %v4176_v61 = vpop.f32.mrf.mxu0 }
0x19c5   :  { %v3399_v62 = vpop.f32.mrf.mxu1 }
0x19c6   :  { %3423 = vrot.lane.b32.xlu1 %v3399_v62, %s4334_s25 }
0x19c7   :  { %v4181_v63 = vpop.f32.mrf.mxu1 }
0x1a34   :  { %v3422_v20 = vpop.permute.xlu0 %3421 }
0x1a35   :  { %v3431_v50 = vsel %vm1634_vm4, %v3429_v49, %v3422_v20 }
0x1a36   :  { %4190 = vmatprep.mubr.msk.f32.mxu0 %vm95_vm0, %v3431_v50 }
0x1a38   :  { %v3424_v24 = vpop.permute.xlu1 %3423 }
0x1a39   :  { %v3432_v11 = vsel %vm1634_vm4, %v3430_v28, %v3424_v24 }
0x1a3a   :  { %4191 = vmatmul.mubr.msk.f32.vlgmr.msra.gmra.mxu0 %vm95_vm0, %v3432_v11 }
0x1a3b   :  { %4205 = vmatpush3.msra.mxu0 %v4733_v37 }
0x1a3c   :  { %4206 = vmatprep.subr.mxu0 %v4738_v51 }
0x1a3d   :  { %4207 = vmatpush3.msra.mxu0 %v4738_v51 }
0x1a3e   :  { %4208 = vmatprep.subr.mxu0 %v4746_v46 }
0x1a3f   :  { %4209 = vmatpush3.msra.mxu0 %v4746_v46 }
0x1a40   :  { %4210 = vmatprep.subr.mxu0 %v4753_v44 }
0x1a41   :  { %4211 = vmatpush3.msra.mxu0 %v4753_v44 }
0x1a42   :  { %4212 = vmatprep.subr.mxu0 %v4786_v18 }
0x1a43   :  { %4213 = vmatpush3.msra.mxu0 %v4786_v18 }
0x1a44   :  { %4214 = vmatprep.subr.mxu0 %v4793_v0 }
0x1a45   :  { %4215 = vmatpush3.msra.mxu0 %v4793_v0 }
0x1a46   :  { %4216 = vmatprep.subr.mxu0 %v4800_v1 }
0x1a47   :  { %4217 = vmatpush3.msra.mxu0 %v4800_v1 }
0x1a48   :  { %4218 = vmatprep.subr.mxu0 %v4806_v2 }
0x1a49   :  { %4219 = vmatpush3.msra.mxu0 %v4806_v2 }
0x1afa   :  { %v4192_v37 = vpop.f32.mrf.mxu0 }
0x1afb   :  { %v3511_v51 = vadd.f32 %v4192_v37, %v4692_v58 }
0x1afc   :  { %v3505_v46 = vpop.f32.mrf.mxu0 }
0x1afd   :  { %v3515_v44 = vadd.f32 %v3511_v51, %v4847_v22  ;;  %v3506_v18 = vadd.f32 %v4692_v58, %v3505_v46 }
0x1aff   :  { %v3514_v25 = vadd.f32 %v3506_v18, %v4850_v23  ;;  %v3519_v0 = vsel %vm95_vm0, %v3515_v44, 0.0 }
0x1b00   :  { %3520 = vadd.xlane.f32.xlu1 %v3519_v0 }
0x1b01   :  { %v3516_v4 = vsel %vm95_vm0, %v3514_v25, 0.0 }
0x1b02   :  { %3517 = vadd.xlane.f32.xlu0 %v3516_v4 }
0x1b89   :  { %v3521_v1 = vpop.xlane.xlu1 %3520 }
0x1b8a   :  { %v3523_v29 = vmul.f32 0.03125, %v3521_v1 }
0x1b8b   :  { %v3518_v30 = vpop.xlane.xlu0 %3517 }
0x1b8c   :  { %v3522_v2 = vmul.f32 0.03125, %v3518_v30  ;;  %v3525_v31 = vsub.f32 %v3515_v44, %v3523_v29 }
0x1b8e   :  { %v3524_v32 = vsub.f32 %v3514_v25, %v3522_v2  ;;  %v3527_v22 = vmul.f32 %v3525_v31, %v3525_v31 }
0x1b90   :  { %v3526_v33 = vmul.f32 %v3524_v32, %v3524_v32  ;;  %v3531_v58 = vsel %vm95_vm0, %v3527_v22, 0.0 }
0x1b92   :  { %v3528_v38 = vsel %vm95_vm0, %v3526_v33, 0.0 }
0x1b93   :  { %3529 = vadd.xlane.f32.xlu0 %v3528_v38 }
0x1b97   :  { %3532 = vadd.xlane.f32.xlu0 %v3531_v58 }
0x1c1c   :  { %v3530_v23 = vpop.xlane.xlu0 %3529 }
0x1c1d   :  { %v3534_v39 = vmul.f32 0.03125, %v3530_v23 }
0x1c1f   :  { %v3536_v42 = vadd.f32 1e-05, %v3534_v39 }
0x1c20   :  { %v3533_v43 = vpop.xlane.xlu0 %3532 }
0x1c21   :  { %4311 = vrsqrt.f32 %v3536_v42  ;;  %v3535_v36 = vmul.f32 0.03125, %v3533_v43 }
0x1c23   :  { %v3537_v45 = vadd.f32 1e-05, %v3535_v36 }
0x1c25   :  { %4313 = vrsqrt.f32 %v3537_v45 }
0x1c2e   :  { %v4312_v14 = vpop.eup %4311 }
0x1c2f   :  { %v3540_v47 = vmul.f32 %v4312_v14, %v3524_v32 }
0x1c31   :  { %v3542_v12 = vmul.f32 %v4762_v5, %v3540_v47 }
0x1c32   :  { %v4314_v52 = vpop.eup %4313 }
0x1c33   :  { %v3541_v53 = vmul.f32 %v4314_v52, %v3525_v31  ;;  %v3544_v34 = vadd.f32 %v4767_v7, %v3542_v12 }
0x1c35   :  { %4201 = vmatprep.mubr.msk.f32.mxu1 %vm95_vm0, %v3544_v34  ;;  %v3543_v54 = vmul.f32 %v4762_v5, %v3541_v53 }
0x1c37   :  { %v3545_v40 = vadd.f32 %v4767_v7, %v3543_v54 }
0x1c39   :  { %4202 = vmatmul.mubr.msk.f32.vlgmr.msra.gmra.mxu1 %vm95_vm0, %v3545_v40 }
0x1cf9   :  { %v4203_v27 = vpop.f32.mrf.mxu1 }
0x1cfa   :  { %v3624_v55 = vadd.f32 %v4203_v27, %v4815_v3 }
0x1cfb   :  { %v3618_v17 = vpop.f32.mrf.mxu1 }
0x1cfc   :  { %v3619_v56 = vadd.f32 %v4815_v3, %v3618_v17  ;;  %v3628_v57 = vmax.f32 %v3624_v55, 0.0 }
0x1cfe   :  { %v3627_v60 = vmax.f32 %v3619_v56, 0.0 }
0x1d00   :  { %4220 = vmatprep.mubr.msk.f32.mxu0 %vm1864_vm5, %v3627_v60 }
0x1d01   :  { %4221 = vmatmul.mubr.msk.f32.vlgmr.msra.gmra.mxu0 %vm1864_vm5, %v3628_v57 }
0x1dc1   :  { %v4222_v59 = vpop.f32.mrf.mxu0 }
0x1dc2   :  { %v3707_v6 = vadd.f32 %v4222_v59, %v4826_v26 }
0x1dc3   :  { %v3701_v5 = vpop.f32.mrf.mxu0 }
0x1dc4   :  { %v3711_v10 = vadd.f32 %v3707_v6, %v3545_v40  ;;  %v3702_v7 = vadd.f32 %v4826_v26, %v3701_v5 }
0x1dc6   :  { %v3710_v19 = vadd.f32 %v3702_v7, %v3544_v34  ;;  %v3715_v35 = vsel %vm95_vm0, %v3711_v10, 0.0 }
0x1dc7   :  { %3716 = vadd.xlane.f32.xlu0 %v3715_v35 }
0x1dc8   :  { %v3712_v61 = vsel %vm95_vm0, %v3710_v19, 0.0 }
0x1dc9   :  { %3713 = vadd.xlane.f32.xlu1 %v3712_v61 }
0x1e50   :  { %v3717_v3 = vpop.xlane.xlu0 %3716 }
0x1e51   :  { %v3719_v62 = vmul.f32 0.03125, %v3717_v3 }
0x1e52   :  { %v3714_v63 = vpop.xlane.xlu1 %3713 }
0x1e53   :  { %v3721_v8 = vsub.f32 %v3711_v10, %v3719_v62  ;;  %v3718_v48 = vmul.f32 0.03125, %v3714_v63 }
0x1e55   :  { %v3720_v41 = vsub.f32 %v3710_v19, %v3718_v48  ;;  %v3723_v15 = vmul.f32 %v3721_v8, %v3721_v8 }
0x1e57   :  { %v3727_v16 = vsel %vm95_vm0, %v3723_v15, 0.0  ;;  %v3722_v49 = vmul.f32 %v3720_v41, %v3720_v41 }
0x1e58   :  { %3728 = vadd.xlane.f32.xlu0 %v3727_v16 }
0x1e59   :  { %v3724_v26 = vsel %vm95_vm0, %v3722_v49, 0.0 }
0x1e5a   :  { %3725 = vadd.xlane.f32.xlu1 %v3724_v26 }
0x1ee1   :  { %v3729_v20 = vpop.xlane.xlu0 %3728 }
0x1ee2   :  { %v3731_v50 = vmul.f32 0.03125, %v3729_v20 }
0x1ee3   :  { %v3726_v21 = vpop.xlane.xlu1 %3725 }
0x1ee4   :  { %v3733_v28 = vadd.f32 1e-05, %v3731_v50  ;;  %v3730_v24 = vmul.f32 0.03125, %v3726_v21 }
0x1ee6   :  { %4315 = vrsqrt.f32 %v3733_v28  ;;  %v3732_v11 = vadd.f32 1e-05, %v3730_v24 }
0x1ee8   :  { %4317 = vrsqrt.f32 %v3732_v11 }
0x1ef3   :  { %v4316_v37 = vpop.eup %4315 }
0x1ef4   :  { %v3737_v51 = vmul.f32 %v4316_v37, %v3721_v8 }
0x1ef5   :  { %v4318_v46 = vpop.eup %4317 }
0x1ef6   :  { %v3739_v44 = vmul.f32 %v4837_v9, %v3737_v51  ;;  %v3736_v18 = vmul.f32 %v4318_v46, %v3720_v41 }
0x1ef8   :  { %v3741_v25 = vadd.f32 %v4842_v13, %v3739_v44  ;;  %v3738_v0 = vmul.f32 %v4837_v9, %v3736_v18 }
0x1efa   :  { %3743 = vst.msk [vmem:[%s5110_s14 + $0x8] sm:$0xff] %vm95_vm0, %v3741_v25  ;;  %v3740_v4 = vadd.f32 %v4842_v13, %v3738_v0 }
0x1efc   :  { %3742 = vst.msk [vmem:[%s5110_s14] sm:$0xff] %vm95_vm0, %v3740_v4 }

</bundles_post_ra>
